<compile_context>
chip_gen: v7x
topology: tpu7x:2x2x1
jax: 0.10.0
libtpu: 0.0.40
codegen_flags: <defaults>
</compile_context>

<pallas_src>
import jax
import jax.numpy as jnp
from jax import lax
from jax.experimental import pallas as pl
from jax.experimental.pallas import tpu as pltpu


_CONTRACT_LAST = (((1,), (1,)), ((), ()))  # A @ B.T without materializing B.T


def _l2_normalize(f):
    # torch F.normalize clamps ||x||; rsqrt(sum + eps) only differs for ~0 rows.
    return f * lax.rsqrt(jnp.sum(f * f, axis=-1, keepdims=True) + 1e-12)


def _vmem():
    # whole-array block resident in VMEM (gridless helper kernel)
    return pl.BlockSpec(memory_space=pltpu.MemorySpace.VMEM)


# ----------------------------------------------------------------------------
# One-time kernel: text features (constant across adaptation steps).
#   txt_f = normalize(text_x_pad @ w_txt)
# ----------------------------------------------------------------------------
def _text_encode_kernel(text_ref, w_txt_ref, txtf_ref):
    ft = jnp.dot(text_ref[...], w_txt_ref[...],
                 preferred_element_type=jnp.float32)
    txtf_ref[...] = _l2_normalize(ft)


def encode_text(text_pad_bf16, w_txt_bf16):
    Np, Dt = text_pad_bf16.shape
    D = w_txt_bf16.shape[1]
    ce = pl.CostEstimate(
        flops=2 * Np * Dt * D,
        transcendentals=Np,
        bytes_accessed=text_pad_bf16.size * 2 + w_txt_bf16.size * 2 + Np * D * 4)
    return pl.pallas_call(
        _text_encode_kernel,
        out_shape=jax.ShapeDtypeStruct((Np, D), jnp.float32),
        in_specs=[_vmem(), _vmem()],
        out_specs=_vmem(),
        compiler_params=pltpu.CompilerParams(vmem_limit_bytes=64 * 1024 * 1024),
        cost_estimate=ce,
    )(text_pad_bf16, w_txt_bf16)


# ----------------------------------------------------------------------------
# Fused per-step kernel: image encode (K-tiled) + classification logits
#   + in-kernel top-K + category-embedding gather + pred-prompt encode
#   + CLIPArTT targets + transpose-free cross-entropy loss.
# ----------------------------------------------------------------------------
def _make_step_kernel(n_text, topk, scale, tau):
    def kernel(x_ref, w_img_ref, txtf_ref, w_txt_ref, cat_ref,
               logits_ref, loss_ref, acc_ref):
        k = pl.program_id(0)

        @pl.when(k == 0)
        def _():
            acc_ref[...] = jnp.zeros_like(acc_ref)

        # Partial image projection for this D_img_in tile (bf16 MXU, f32 acc).
        acc_ref[...] += jnp.dot(x_ref[...], w_img_ref[...],
                                preferred_element_type=jnp.float32)

        @pl.when(k == pl.num_programs(0) - 1)
        def _():
            fi = _l2_normalize(acc_ref[...])          # (B, D)  image features
            ft = txtf_ref[...]                        # (Np, D) normalized text

            # Classification logits: scale * img_f @ txt_f.T (no transpose).
            logits = scale * lax.dot_general(
                fi, ft, _CONTRACT_LAST, preferred_element_type=jnp.float32)
            logits_ref[...] = logits                  # lane-dense (B, Np) store

            B, Np = logits.shape
            col = lax.broadcasted_iota(jnp.int32, (B, Np), 1)
            neg = jnp.float32(-1e30)
            # Mask padded categories; softmax is monotone per row so top-K over
            # raw logits == top-K over similarity (sim is never materialized).
            work = jnp.where(col < n_text, logits, neg)

            # In-kernel top-K via iterative masked argmax -> 0/1 selection mask.
            sel = jnp.zeros_like(logits)
            for _ in range(topk):
                m = jnp.max(work, axis=-1, keepdims=True)
                first = jnp.min(jnp.where(work >= m, col, Np),
                                axis=-1, keepdims=True)
                pick = (col == first)
                sel = sel + pick.astype(jnp.float32)
                work = jnp.where(pick, neg, work)

            # "getprompt + tokenize" stand-in: mean of the top-K category
            # embeddings, gathered as a selection-matrix matmul (cat_embed is
            # tiny and lives whole in VMEM).
            pred_embed = jnp.dot(sel, cat_ref[...],
                                 preferred_element_type=jnp.float32)
            pred_embed = pred_embed * (1.0 / topk)    # (B, Dt)

            # Pred-prompt text features.
            fp = jnp.dot(pred_embed.astype(jnp.bfloat16), w_txt_ref[...],
                         preferred_element_type=jnp.float32)
            fp = _l2_normalize(fp)                    # (B, D)

            # Adaptation logits and CLIPArTT targets (target_method == 1).
            adapt_logits = scale * lax.dot_general(
                fi, fp, _CONTRACT_LAST, preferred_element_type=jnp.float32)
            sim_ii = lax.dot_general(fi, fi, _CONTRACT_LAST,
                                     preferred_element_type=jnp.float32)
            sim_tt = lax.dot_general(fp, fp, _CONTRACT_LAST,
                                     preferred_element_type=jnp.float32)
            t = (sim_ii + sim_tt) * (0.5 / tau)
            tm = jnp.max(t, axis=-1, keepdims=True)
            te = jnp.exp(t - tm)
            targets = te * pl.reciprocal(jnp.sum(te, axis=-1, keepdims=True),
                                         approx=True)

            # cross_entropy(logits.T, targets.T).mean(), transpose-free:
            # row log-softmax of logits.T == column log-softmax of adapt_logits.
            cm = jnp.max(adapt_logits, axis=0, keepdims=True)
            shift = adapt_logits - cm
            col_ls = shift - jnp.log(
                jnp.sum(jnp.exp(shift), axis=0, keepdims=True))
            n_rows_t = adapt_logits.shape[1]          # rows of logits.T
            loss_ref[0, 0] = jnp.sum(-targets * col_ls) / n_rows_t

    return kernel


def _pick_ktile(d_in):
    for t in (256, 512, 128):
        if d_in % t == 0:
            return t
    return d_in


def clipartt_step(x_flat_bf16, w_img_bf16, txt_f, w_txt_bf16, cat_pad,
                  n_text, K=5, scale=100.0, tau=0.01):
    B, D_in = x_flat_bf16.shape
    D = w_img_bf16.shape[1]
    Np = txt_f.shape[0]
    Dt = cat_pad.shape[1]
    tk = _pick_ktile(D_in)
    kt = D_in // tk

    flops = (2 * B * D_in * D          # image encode
             + 2 * B * Np * D          # classification logits
             + 2 * B * Np * Dt         # top-K gather matmul
             + 2 * B * Dt * D          # pred-prompt encode
             + 3 * 2 * B * B * D)      # adapt logits + image/text similarities
    bytes_accessed = (x_flat_bf16.size * 2 + w_img_bf16.size * 2
                      + txt_f.size * 4 + w_txt_bf16.size * 2
                      + cat_pad.size * 4 + B * Np * 4 + 4)
    ce = pl.CostEstimate(flops=flops,
                         transcendentals=4 * B * B + 2 * B,
                         bytes_accessed=bytes_accessed)

    kernel = _make_step_kernel(n_text, K, scale, tau)
    logits_pad, loss = pl.pallas_call(
        kernel,
        grid=(kt,),
        out_shape=(jax.ShapeDtypeStruct((B, Np), jnp.float32),   # logits (padded)
                   jax.ShapeDtypeStruct((1, 1), jnp.float32)),   # scalar loss
        in_specs=[
            pl.BlockSpec((B, tk), lambda k: (0, k)),     # x tile (bf16)
            pl.BlockSpec((tk, D), lambda k: (k, 0)),     # w_img tile (bf16)
            pl.BlockSpec((Np, D), lambda k: (0, 0)),     # txt_f, VMEM-resident
            pl.BlockSpec((Dt, D), lambda k: (0, 0)),     # w_txt, VMEM-resident
            pl.BlockSpec((Np, Dt), lambda k: (0, 0)),    # cat_embed, resident
        ],
        out_specs=(
            pl.BlockSpec((B, Np), lambda k: (0, 0)),
            pl.BlockSpec((1, 1), lambda k: (0, 0),
                         memory_space=pltpu.MemorySpace.SMEM),
        ),
        scratch_shapes=[pltpu.VMEM((B, D), jnp.float32)],        # img_proj acc
        compiler_params=pltpu.CompilerParams(
            dimension_semantics=("arbitrary",),
            vmem_limit_bytes=64 * 1024 * 1024),
        cost_estimate=ce,
    )(x_flat_bf16, w_img_bf16, txt_f, w_txt_bf16, cat_pad)
    return logits_pad, loss[0, 0]


# ----------------------------------------------------------------------------
# Tent wrapper (synthetic CLIP)
# ----------------------------------------------------------------------------
def tent_forward(x_nchw, text_x, params, K=5, steps=1):
    B = x_nchw.shape[0]
    N = text_x.shape[0]
    D_txt_in = text_x.shape[1]

    # bf16 operand pre-cast in the wrapper (f32 accumulation stays in-kernel).
    x_flat = x_nchw.reshape(B, -1).astype(jnp.bfloat16)
    w_img = params["w_img"].astype(jnp.bfloat16)
    w_txt = params["w_txt"].astype(jnp.bfloat16)

    # Lane-dense category axis: pad N_text up to a multiple of 128.
    Np = max(128, ((N + 127) // 128) * 128)
    text_pad = jnp.zeros((Np, D_txt_in), jnp.bfloat16).at[:N].set(
        text_x.astype(jnp.bfloat16))
    cat_pad = jnp.zeros((Np, D_txt_in), jnp.float32).at[:N].set(
        params["cat_embed"].astype(jnp.float32))

    # Hoisted once: text features never change across steps or images.
    txt_f = encode_text(text_pad, w_txt)

    logits_pad = None
    loss = jnp.float32(0.0)
    for _ in range(steps):
        logits_pad, loss = clipartt_step(
            x_flat, w_img, txt_f, w_txt, cat_pad,
            n_text=N, K=K, scale=100.0, tau=0.01)
        # TODO(synk): loss.backward() + optimizer.step() skipped (no clean
        # Pallas equivalent); parameters are never updated.

    # Parameters are never updated, so the final `model(x, text_x)` logits are
    # bit-identical to the per-step logits above — no recompute needed.
    return logits_pad[:, :N], loss


if __name__ == "__main__":
    key = jax.random.PRNGKey(0)
    k1, k2, k3, k4, k5 = jax.random.split(key, 5)

    B, C, H, W = 8, 4, 16, 16          # images, NCHW
    D_img_in = C * H * W               # 1024
    D_txt_in = 256
    D_embed = 128
    N_text = 16                        # number of category prompts
    K = 5

    params = {
        "w_img": jax.random.normal(k1, (D_img_in, D_embed), jnp.float32) * 0.02,
        "w_txt": jax.random.normal(k2, (D_txt_in, D_embed), jnp.float32) * 0.02,
        "cat_embed": jax.random.normal(k3, (N_text, D_txt_in), jnp.float32),
    }

    x = jax.random.normal(k4, (B, C, H, W), jnp.float32)
    text_x = jax.random.normal(k5, (N_text, D_txt_in), jnp.float32)

    fwd = jax.jit(tent_forward, static_argnames=("K", "steps"))
    logits, loss = fwd(x, text_x, params, K=K, steps=1)
    jax.block_until_ready((logits, loss))

    assert logits.shape == (B, N_text)
    assert bool(jnp.all(jnp.isfinite(logits)))
    assert bool(jnp.isfinite(loss))
    print("KERNEL_OK")
</pallas_src>

<mosaic_0001>
module attributes {stable_mosaic.version = 11 : i64} {
  func.func @_text_encode_kernel(%arg0: memref<128x256xbf16, #tpu.memory_space<vmem>>, %arg1: memref<256x128xbf16, #tpu.memory_space<vmem>>, %arg2: memref<128x128xf32, #tpu.memory_space<vmem>>) attributes {dimension_semantics = [], scalar_prefetch = 0 : i64, scratch_operands = 0 : i64, tpu.core_type = #tpu.core_type<tc>} {
    %c0 = arith.constant 0 : index
    %c0_0 = arith.constant 0 : index
    %0 = vector.load %arg0[%c0, %c0_0] : memref<128x256xbf16, #tpu.memory_space<vmem>>, vector<128x256xbf16>
    %c0_1 = arith.constant 0 : index
    %c0_2 = arith.constant 0 : index
    %1 = vector.load %arg1[%c0_1, %c0_2] : memref<256x128xbf16, #tpu.memory_space<vmem>>, vector<256x128xbf16>
    %cst = arith.constant dense<0.000000e+00> : vector<128x128xf32>
    %2 = tpu.matmul %0, %1, %cst {dimension_numbers = #tpu.dot_dimension_numbers<[1], [0], [0], [1], [0, 0, 1, 1], [], []>} : vector<128x256xbf16>, vector<256x128xbf16>, vector<128x128xf32> -> vector<128x128xf32>
    %3 = arith.mulf %2, %2 : vector<128x128xf32>
    %cst_3 = arith.constant dense<0.000000e+00> : vector<128xf32>
    %4 = vector.multi_reduction <add>, %3, %cst_3 [1] : vector<128x128xf32> to vector<128xf32>
    %5 = vector.shape_cast %4 : vector<128xf32> to vector<128x1xf32>
    %cst_4 = arith.constant 9.99999996E-13 : f32
    %6 = vector.broadcast %cst_4 : f32 to vector<128x1xf32>
    %7 = arith.addf %5, %6 : vector<128x1xf32>
    %8 = math.rsqrt %7 : vector<128x1xf32>
    %9 = vector.broadcast %8 : vector<128x1xf32> to vector<128x128xf32>
    %10 = arith.mulf %2, %9 : vector<128x128xf32>
    %c0_5 = arith.constant 0 : index
    %c0_6 = arith.constant 0 : index
    %11 = vector.load %arg2[%c0_5, %c0_6] : memref<128x128xf32, #tpu.memory_space<vmem>>, vector<128x128xf32>
    tpu.vector_store %arg2[%c0_5, %c0_6], %10 {strides = array<i32>} : memref<128x128xf32, #tpu.memory_space<vmem>>, vector<128x128xf32>,
    return
  }
}

module attributes {stable_mosaic.version = 11 : i64} {
  func.func @kernel(%arg0: i32, %arg1: memref<8x256xbf16, #tpu.memory_space<vmem>>, %arg2: memref<256x128xbf16, #tpu.memory_space<vmem>>, %arg3: memref<128x128xf32, #tpu.memory_space<vmem>>, %arg4: memref<256x128xbf16, #tpu.memory_space<vmem>>, %arg5: memref<128x256xf32, #tpu.memory_space<vmem>>, %arg6: memref<8x128xf32, #tpu.memory_space<vmem>>, %arg7: memref<1x1xf32, #tpu.memory_space<smem>>, %arg8: memref<8x128xf32, #tpu.memory_space<vmem>>) attributes {dimension_semantics = [#tpu.dimension_semantics<arbitrary>], iteration_bounds = array<i64: 4>, scalar_prefetch = 0 : i64, scratch_operands = 1 : i64, tpu.core_type = #tpu.core_type<tc>, window_params = [{transform_indices = @transform_0, window_bounds = array<i64: 8, 256>}, {transform_indices = @transform_1, window_bounds = array<i64: 256, 128>}, {pipeline_mode = #tpu.pipeline_mode<synchronous>, transform_indices = @transform_2, window_bounds = array<i64: 128, 128>}, {pipeline_mode = #tpu.pipeline_mode<synchronous>, transform_indices = @transform_3, window_bounds = array<i64: 256, 128>}, {pipeline_mode = #tpu.pipeline_mode<synchronous>, transform_indices = @transform_4, window_bounds = array<i64: 128, 256>}, {pipeline_mode = #tpu.pipeline_mode<synchronous>, transform_indices = @transform_5, window_bounds = array<i64: 8, 128>}, {transform_indices = @transform_6, window_bounds = array<i64: 1, 1>}]} {
    %c0_i32 = arith.constant 0 : i32
    %0 = arith.cmpi eq, %arg0, %c0_i32 : i32
    %1 = arith.extui %0 : i1 to i32
    %c0_i32_0 = arith.constant 0 : i32
    %2 = arith.cmpi ne, %1, %c0_i32_0 : i32
    scf.if %2 {
      %cst_9 = arith.constant 0.000000e+00 : f32
      %12 = vector.broadcast %cst_9 : f32 to vector<8x128xf32>
      %c0_10 = arith.constant 0 : index
      %c0_11 = arith.constant 0 : index
      %13 = vector.load %arg8[%c0_10, %c0_11] : memref<8x128xf32, #tpu.memory_space<vmem>>, vector<8x128xf32>
      tpu.vector_store %arg8[%c0_10, %c0_11], %12 {strides = array<i32>} : memref<8x128xf32, #tpu.memory_space<vmem>>, vector<8x128xf32>,
    } else {
    }
    %c0 = arith.constant 0 : index
    %c0_1 = arith.constant 0 : index
    %3 = vector.load %arg8[%c0, %c0_1] : memref<8x128xf32, #tpu.memory_space<vmem>>, vector<8x128xf32>
    %c0_2 = arith.constant 0 : index
    %c0_3 = arith.constant 0 : index
    %4 = vector.load %arg1[%c0_2, %c0_3] : memref<8x256xbf16, #tpu.memory_space<vmem>>, vector<8x256xbf16>
    %c0_4 = arith.constant 0 : index
    %c0_5 = arith.constant 0 : index
    %5 = vector.load %arg2[%c0_4, %c0_5] : memref<256x128xbf16, #tpu.memory_space<vmem>>, vector<256x128xbf16>
    %cst = arith.constant dense<0.000000e+00> : vector<8x128xf32>
    %6 = tpu.matmul %4, %5, %cst {dimension_numbers = #tpu.dot_dimension_numbers<[1], [0], [0], [1], [0, 0, 1, 1], [], []>} : vector<8x256xbf16>, vector<256x128xbf16>, vector<8x128xf32> -> vector<8x128xf32>
    %7 = arith.addf %3, %6 : vector<8x128xf32>
    %c0_6 = arith.constant 0 : index
    %c0_7 = arith.constant 0 : index
    %8 = vector.load %arg8[%c0_6, %c0_7] : memref<8x128xf32, #tpu.memory_space<vmem>>, vector<8x128xf32>
    tpu.vector_store %arg8[%c0_6, %c0_7], %7 {strides = array<i32>} : memref<8x128xf32, #tpu.memory_space<vmem>>, vector<8x128xf32>,
    %c3_i32 = arith.constant 3 : i32
    %9 = arith.cmpi eq, %arg0, %c3_i32 : i32
    %10 = arith.extui %9 : i1 to i32
    %c0_i32_8 = arith.constant 0 : i32
    %11 = arith.cmpi ne, %10, %c0_i32_8 : i32
    scf.if %11 {
      %c0_9 = arith.constant 0 : index
      %c0_10 = arith.constant 0 : index
      %12 = vector.load %arg8[%c0_9, %c0_10] : memref<8x128xf32, #tpu.memory_space<vmem>>, vector<8x128xf32>
      %13 = arith.mulf %12, %12 : vector<8x128xf32>
      %cst_11 = arith.constant dense<0.000000e+00> : vector<8xf32>
      %14 = vector.multi_reduction <add>, %13, %cst_11 [1] : vector<8x128xf32> to vector<8xf32>
      %15 = vector.shape_cast %14 : vector<8xf32> to vector<8x1xf32>
      %cst_12 = arith.constant 9.99999996E-13 : f32
      %16 = vector.broadcast %cst_12 : f32 to vector<8x1xf32>
      %17 = arith.addf %15, %16 : vector<8x1xf32>
      %18 = math.rsqrt %17 : vector<8x1xf32>
      %19 = vector.broadcast %18 : vector<8x1xf32> to vector<8x128xf32>
      %20 = arith.mulf %12, %19 : vector<8x128xf32>
      %c0_13 = arith.constant 0 : index
      %c0_14 = arith.constant 0 : index
      %21 = vector.load %arg3[%c0_13, %c0_14] : memref<128x128xf32, #tpu.memory_space<vmem>>, vector<128x128xf32>
      %cst_15 = arith.constant dense<0.000000e+00> : vector<8x128xf32>
      %22 = tpu.matmul %20, %21, %cst_15 {dimension_numbers = #tpu.dot_dimension_numbers<[1], [1], [0], [0], [0, 0, 1, 0], [], []>} : vector<8x128xf32>, vector<128x128xf32>, vector<8x128xf32> -> vector<8x128xf32>
      %cst_16 = arith.constant 1.000000e+02 : f32
      %23 = vector.broadcast %cst_16 : f32 to vector<8x128xf32>
      %24 = arith.mulf %23, %22 : vector<8x128xf32>
      %c0_17 = arith.constant 0 : index
      %c0_18 = arith.constant 0 : index
      %25 = vector.load %arg6[%c0_17, %c0_18] : memref<8x128xf32, #tpu.memory_space<vmem>>, vector<8x128xf32>
      tpu.vector_store %arg6[%c0_17, %c0_18], %24 {strides = array<i32>} : memref<8x128xf32, #tpu.memory_space<vmem>>, vector<8x128xf32>,
      %26 = tpu.iota {dimensions = array<i32: 1>} : vector<8x128xi32>
      %c16_i32 = arith.constant 16 : i32
      %27 = vector.broadcast %c16_i32 : i32 to vector<8x128xi32>
      %28 = arith.cmpi slt, %26, %27 : vector<8x128xi32>
      %cst_19 = arith.constant -1.000000e+30 : f32
      %29 = vector.broadcast %cst_19 : f32 to vector<8x128xf32>
      %30 = arith.select %28, %24, %29 : vector<8x128xi1>, vector<8x128xf32>
      %cst_20 = arith.constant 0.000000e+00 : f32
      %31 = vector.broadcast %cst_20 : f32 to vector<8x128xf32>
      %cst_21 = arith.constant dense<0xFF800000> : vector<8xf32>
      %32 = vector.multi_reduction <maximumf>, %30, %cst_21 [1] : vector<8x128xf32> to vector<8xf32>
      %33 = vector.shape_cast %32 : vector<8xf32> to vector<8x1xf32>
      %34 = vector.broadcast %33 : vector<8x1xf32> to vector<8x128xf32>
      %35 = arith.cmpf oge, %30, %34 : vector<8x128xf32>
      %c128_i32 = arith.constant 128 : i32
      %36 = vector.broadcast %c128_i32 : i32 to vector<8x128xi32>
      %37 = arith.select %35, %26, %36 : vector<8x128xi1>, vector<8x128xi32>
      %cst_22 = arith.constant dense<2147483647> : vector<8xi32>
      %38 = vector.multi_reduction <minsi>, %37, %cst_22 [1] : vector<8x128xi32> to vector<8xi32>
      %39 = vector.shape_cast %38 : vector<8xi32> to vector<8x1xi32>
      %40 = vector.broadcast %39 : vector<8x1xi32> to vector<8x128xi32>
      %41 = arith.cmpi eq, %26, %40 : vector<8x128xi32>
      %42 = arith.extui %41 : vector<8x128xi1> to vector<8x128xi32>
      %43 = arith.sitofp %42 : vector<8x128xi32> to vector<8x128xf32>
      %44 = arith.addf %31, %43 : vector<8x128xf32>
      %cst_23 = arith.constant -1.000000e+30 : f32
      %45 = vector.broadcast %cst_23 : f32 to vector<8x128xf32>
      %46 = arith.select %41, %45, %30 : vector<8x128xi1>, vector<8x128xf32>
      %cst_24 = arith.constant dense<0xFF800000> : vector<8xf32>
      %47 = vector.multi_reduction <maximumf>, %46, %cst_24 [1] : vector<8x128xf32> to vector<8xf32>
      %48 = vector.shape_cast %47 : vector<8xf32> to vector<8x1xf32>
      %49 = vector.broadcast %48 : vector<8x1xf32> to vector<8x128xf32>
      %50 = arith.cmpf oge, %46, %49 : vector<8x128xf32>
      %c128_i32_25 = arith.constant 128 : i32
      %51 = vector.broadcast %c128_i32_25 : i32 to vector<8x128xi32>
      %52 = arith.select %50, %26, %51 : vector<8x128xi1>, vector<8x128xi32>
      %cst_26 = arith.constant dense<2147483647> : vector<8xi32>
      %53 = vector.multi_reduction <minsi>, %52, %cst_26 [1] : vector<8x128xi32> to vector<8xi32>
      %54 = vector.shape_cast %53 : vector<8xi32> to vector<8x1xi32>
      %55 = vector.broadcast %54 : vector<8x1xi32> to vector<8x128xi32>
      %56 = arith.cmpi eq, %26, %55 : vector<8x128xi32>
      %57 = arith.extui %56 : vector<8x128xi1> to vector<8x128xi32>
      %58 = arith.sitofp %57 : vector<8x128xi32> to vector<8x128xf32>
      %59 = arith.addf %44, %58 : vector<8x128xf32>
      %cst_27 = arith.constant -1.000000e+30 : f32
      %60 = vector.broadcast %cst_27 : f32 to vector<8x128xf32>
      %61 = arith.select %56, %60, %46 : vector<8x128xi1>, vector<8x128xf32>
      %cst_28 = arith.constant dense<0xFF800000> : vector<8xf32>
      %62 = vector.multi_reduction <maximumf>, %61, %cst_28 [1] : vector<8x128xf32> to vector<8xf32>
      %63 = vector.shape_cast %62 : vector<8xf32> to vector<8x1xf32>
      %64 = vector.broadcast %63 : vector<8x1xf32> to vector<8x128xf32>
      %65 = arith.cmpf oge, %61, %64 : vector<8x128xf32>
      %c128_i32_29 = arith.constant 128 : i32
      %66 = vector.broadcast %c128_i32_29 : i32 to vector<8x128xi32>
      %67 = arith.select %65, %26, %66 : vector<8x128xi1>, vector<8x128xi32>
      %cst_30 = arith.constant dense<2147483647> : vector<8xi32>
      %68 = vector.multi_reduction <minsi>, %67, %cst_30 [1] : vector<8x128xi32> to vector<8xi32>
      %69 = vector.shape_cast %68 : vector<8xi32> to vector<8x1xi32>
      %70 = vector.broadcast %69 : vector<8x1xi32> to vector<8x128xi32>
      %71 = arith.cmpi eq, %26, %70 : vector<8x128xi32>
      %72 = arith.extui %71 : vector<8x128xi1> to vector<8x128xi32>
      %73 = arith.sitofp %72 : vector<8x128xi32> to vector<8x128xf32>
      %74 = arith.addf %59, %73 : vector<8x128xf32>
      %cst_31 = arith.constant -1.000000e+30 : f32
      %75 = vector.broadcast %cst_31 : f32 to vector<8x128xf32>
      %76 = arith.select %71, %75, %61 : vector<8x128xi1>, vector<8x128xf32>
      %cst_32 = arith.constant dense<0xFF800000> : vector<8xf32>
      %77 = vector.multi_reduction <maximumf>, %76, %cst_32 [1] : vector<8x128xf32> to vector<8xf32>
      %78 = vector.shape_cast %77 : vector<8xf32> to vector<8x1xf32>
      %79 = vector.broadcast %78 : vector<8x1xf32> to vector<8x128xf32>
      %80 = arith.cmpf oge, %76, %79 : vector<8x128xf32>
      %c128_i32_33 = arith.constant 128 : i32
      %81 = vector.broadcast %c128_i32_33 : i32 to vector<8x128xi32>
      %82 = arith.select %80, %26, %81 : vector<8x128xi1>, vector<8x128xi32>
      %cst_34 = arith.constant dense<2147483647> : vector<8xi32>
      %83 = vector.multi_reduction <minsi>, %82, %cst_34 [1] : vector<8x128xi32> to vector<8xi32>
      %84 = vector.shape_cast %83 : vector<8xi32> to vector<8x1xi32>
      %85 = vector.broadcast %84 : vector<8x1xi32> to vector<8x128xi32>
      %86 = arith.cmpi eq, %26, %85 : vector<8x128xi32>
      %87 = arith.extui %86 : vector<8x128xi1> to vector<8x128xi32>
      %88 = arith.sitofp %87 : vector<8x128xi32> to vector<8x128xf32>
      %89 = arith.addf %74, %88 : vector<8x128xf32>
      %cst_35 = arith.constant -1.000000e+30 : f32
      %90 = vector.broadcast %cst_35 : f32 to vector<8x128xf32>
      %91 = arith.select %86, %90, %76 : vector<8x128xi1>, vector<8x128xf32>
      %cst_36 = arith.constant dense<0xFF800000> : vector<8xf32>
      %92 = vector.multi_reduction <maximumf>, %91, %cst_36 [1] : vector<8x128xf32> to vector<8xf32>
      %93 = vector.shape_cast %92 : vector<8xf32> to vector<8x1xf32>
      %94 = vector.broadcast %93 : vector<8x1xf32> to vector<8x128xf32>
      %95 = arith.cmpf oge, %91, %94 : vector<8x128xf32>
      %c128_i32_37 = arith.constant 128 : i32
      %96 = vector.broadcast %c128_i32_37 : i32 to vector<8x128xi32>
      %97 = arith.select %95, %26, %96 : vector<8x128xi1>, vector<8x128xi32>
      %cst_38 = arith.constant dense<2147483647> : vector<8xi32>
      %98 = vector.multi_reduction <minsi>, %97, %cst_38 [1] : vector<8x128xi32> to vector<8xi32>
      %99 = vector.shape_cast %98 : vector<8xi32> to vector<8x1xi32>
      %100 = vector.broadcast %99 : vector<8x1xi32> to vector<8x128xi32>
      %101 = arith.cmpi eq, %26, %100 : vector<8x128xi32>
      %102 = arith.extui %101 : vector<8x128xi1> to vector<8x128xi32>
      %103 = arith.sitofp %102 : vector<8x128xi32> to vector<8x128xf32>
      %104 = arith.addf %89, %103 : vector<8x128xf32>
      %c0_39 = arith.constant 0 : index
      %c0_40 = arith.constant 0 : index
      %105 = vector.load %arg5[%c0_39, %c0_40] : memref<128x256xf32, #tpu.memory_space<vmem>>, vector<128x256xf32>
      %cst_41 = arith.constant dense<0.000000e+00> : vector<8x256xf32>
      %106 = tpu.matmul %104, %105, %cst_41 {dimension_numbers = #tpu.dot_dimension_numbers<[1], [0], [0], [1], [0, 0, 1, 1], [], []>} : vector<8x128xf32>, vector<128x256xf32>, vector<8x256xf32> -> vector<8x256xf32>
      %cst_42 = arith.constant 2.000000e-01 : f32
      %107 = vector.broadcast %cst_42 : f32 to vector<8x256xf32>
      %108 = arith.mulf %106, %107 : vector<8x256xf32>
      %109 = arith.truncf %108 : vector<8x256xf32> to vector<8x256xbf16>
      %c0_43 = arith.constant 0 : index
      %c0_44 = arith.constant 0 : index
      %110 = vector.load %arg4[%c0_43, %c0_44] : memref<256x128xbf16, #tpu.memory_space<vmem>>, vector<256x128xbf16>
      %cst_45 = arith.constant dense<0.000000e+00> : vector<8x128xf32>
      %111 = tpu.matmul %109, %110, %cst_45 {dimension_numbers = #tpu.dot_dimension_numbers<[1], [0], [0], [1], [0, 0, 1, 1], [], []>} : vector<8x256xbf16>, vector<256x128xbf16>, vector<8x128xf32> -> vector<8x128xf32>
      %112 = arith.mulf %111, %111 : vector<8x128xf32>
      %cst_46 = arith.constant dense<0.000000e+00> : vector<8xf32>
      %113 = vector.multi_reduction <add>, %112, %cst_46 [1] : vector<8x128xf32> to vector<8xf32>
      %114 = vector.shape_cast %113 : vector<8xf32> to vector<8x1xf32>
      %cst_47 = arith.constant 9.99999996E-13 : f32
      %115 = vector.broadcast %cst_47 : f32 to vector<8x1xf32>
      %116 = arith.addf %114, %115 : vector<8x1xf32>
      %117 = math.rsqrt %116 : vector<8x1xf32>
      %118 = vector.broadcast %117 : vector<8x1xf32> to vector<8x128xf32>
      %119 = arith.mulf %111, %118 : vector<8x128xf32>
      %cst_48 = arith.constant dense<0.000000e+00> : vector<8x8xf32>
      %120 = tpu.matmul %20, %119, %cst_48 {dimension_numbers = #tpu.dot_dimension_numbers<[1], [1], [0], [0], [0, 0, 1, 0], [], []>} : vector<8x128xf32>, vector<8x128xf32>, vector<8x8xf32> -> vector<8x8xf32>
      %cst_49 = arith.constant 1.000000e+02 : f32
      %121 = vector.broadcast %cst_49 : f32 to vector<8x8xf32>
      %122 = arith.mulf %121, %120 : vector<8x8xf32>
      %cst_50 = arith.constant dense<0.000000e+00> : vector<8x8xf32>
      %123 = tpu.matmul %20, %20, %cst_50 {dimension_numbers = #tpu.dot_dimension_numbers<[1], [1], [0], [0], [0, 0, 1, 0], [], []>} : vector<8x128xf32>, vector<8x128xf32>, vector<8x8xf32> -> vector<8x8xf32>
      %cst_51 = arith.constant dense<0.000000e+00> : vector<8x8xf32>
      %124 = tpu.matmul %119, %119, %cst_51 {dimension_numbers = #tpu.dot_dimension_numbers<[1], [1], [0], [0], [0, 0, 1, 0], [], []>} : vector<8x128xf32>, vector<8x128xf32>, vector<8x8xf32> -> vector<8x8xf32>
      %125 = arith.addf %123, %124 : vector<8x8xf32>
      %cst_52 = arith.constant 5.000000e+01 : f32
      %126 = vector.broadcast %cst_52 : f32 to vector<8x8xf32>
      %127 = arith.mulf %125, %126 : vector<8x8xf32>
      %cst_53 = arith.constant dense<0xFF800000> : vector<8xf32>
      %128 = vector.multi_reduction <maximumf>, %127, %cst_53 [1] : vector<8x8xf32> to vector<8xf32>
      %129 = vector.shape_cast %128 : vector<8xf32> to vector<8x1xf32>
      %130 = vector.broadcast %129 : vector<8x1xf32> to vector<8x8xf32>
      %131 = arith.subf %127, %130 : vector<8x8xf32>
      %132 = math.exp %131 : vector<8x8xf32>
      %cst_54 = arith.constant dense<0.000000e+00> : vector<8xf32>
      %133 = vector.multi_reduction <add>, %132, %cst_54 [1] : vector<8x8xf32> to vector<8xf32>
      %134 = vector.shape_cast %133 : vector<8xf32> to vector<8x1xf32>
      %135 = tpu.reciprocal %134 {approx = true} : vector<8x1xf32> -> vector<8x1xf32>
      %136 = vector.broadcast %135 : vector<8x1xf32> to vector<8x8xf32>
      %137 = arith.mulf %132, %136 : vector<8x8xf32>
      %cst_55 = arith.constant dense<0xFF800000> : vector<8xf32>
      %138 = vector.multi_reduction <maximumf>, %122, %cst_55 [0] : vector<8x8xf32> to vector<8xf32>
      %139 = vector.shape_cast %138 : vector<8xf32> to vector<1x8xf32>
      %140 = vector.broadcast %139 : vector<1x8xf32> to vector<8x8xf32>
      %141 = arith.subf %122, %140 : vector<8x8xf32>
      %142 = math.exp %141 : vector<8x8xf32>
      %cst_56 = arith.constant dense<0.000000e+00> : vector<8xf32>
      %143 = vector.multi_reduction <add>, %142, %cst_56 [0] : vector<8x8xf32> to vector<8xf32>
      %144 = vector.shape_cast %143 : vector<8xf32> to vector<1x8xf32>
      %145 = math.log %144 : vector<1x8xf32>
      %146 = vector.broadcast %145 : vector<1x8xf32> to vector<8x8xf32>
      %147 = arith.subf %141, %146 : vector<8x8xf32>
      %cst_57 = arith.constant 0.000000e+00 : f32
      %148 = vector.broadcast %cst_57 : f32 to vector<8x8xf32>
      %149 = arith.subf %148, %137 : vector<8x8xf32>
      %150 = arith.mulf %149, %147 : vector<8x8xf32>
      %151 = vector.shape_cast %150 : vector<8x8xf32> to vector<1x8x8xf32>
      %cst_58 = arith.constant dense<0.000000e+00> : vector<1xf32>
      %152 = vector.multi_reduction <add>, %151, %cst_58 [1, 2] : vector<1x8x8xf32> to vector<1xf32>
      %153 = vector.shape_cast %152 : vector<1xf32> to vector<1x1x1xf32>
      %154 = vector.extract %153[0, 0, 0] : f32 from vector<1x1x1xf32>
      %cst_59 = arith.constant 8.000000e+00 : f32
      %155 = arith.divf %154, %cst_59 : f32
      %c0_60 = arith.constant 0 : index
      %c0_61 = arith.constant 0 : index
      %156 = memref.load %arg7[%c0_60, %c0_61] : memref<1x1xf32, #tpu.memory_space<smem>>
      memref.store %155, %arg7[%c0_60, %c0_61] : memref<1x1xf32, #tpu.memory_space<smem>>
    } else {
    }
    return
  }
  func.func @transform_0(%arg0: i32) -> (i32, i32) {
    %c0_i32 = arith.constant 0 : i32
    %c0_i32_0 = arith.constant 0 : i32
    return %c0_i32, %arg0 : i32, i32
  }
  func.func @transform_1(%arg0: i32) -> (i32, i32) {
    %c0_i32 = arith.constant 0 : i32
    %c0_i32_0 = arith.constant 0 : i32
    return %arg0, %c0_i32 : i32, i32
  }
  func.func @transform_2(%arg0: i32) -> (i32, i32) {
    %c0_i32 = arith.constant 0 : i32
    %c0_i32_0 = arith.constant 0 : i32
    %c0_i32_1 = arith.constant 0 : i32
    return %c0_i32, %c0_i32_0 : i32, i32
  }
  func.func @transform_3(%arg0: i32) -> (i32, i32) {
    %c0_i32 = arith.constant 0 : i32
    %c0_i32_0 = arith.constant 0 : i32
    %c0_i32_1 = arith.constant 0 : i32
    return %c0_i32, %c0_i32_0 : i32, i32
  }
  func.func @transform_4(%arg0: i32) -> (i32, i32) {
    %c0_i32 = arith.constant 0 : i32
    %c0_i32_0 = arith.constant 0 : i32
    %c0_i32_1 = arith.constant 0 : i32
    return %c0_i32, %c0_i32_0 : i32, i32
  }
  func.func @transform_5(%arg0: i32) -> (i32, i32) {
    %c0_i32 = arith.constant 0 : i32
    %c0_i32_0 = arith.constant 0 : i32
    %c0_i32_1 = arith.constant 0 : i32
    return %c0_i32, %c0_i32_0 : i32, i32
  }
  func.func @transform_6(%arg0: i32) -> (i32, i32) {
    %c0_i32 = arith.constant 0 : i32
    %c0_i32_0 = arith.constant 0 : i32
    %c0_i32_1 = arith.constant 0 : i32
    return %c0_i32, %c0_i32_0 : i32, i32
  }
}

</mosaic_0001>

<bundles_post_ra>
// kernel: tent_forward.2
= control target key start
LH: loop header
LB: loop body
LE: loop exit
PB: predicated region body
PF: predicated region fallthrough
CT: control target
= control target key end

     0   :  { %7 = vsyncpa [#allocation3], 0  ;;  %s899_s0 = inlined_call_operand.hbm [shape: bf16[128,256], index: 0, kind: input, shape index: {}]   ;;  %s900_s1 = inlined_call_operand.hbm [shape: bf16[256,128], index: 1, kind: input, shape index: {}]   ;;  %s901_s2 = inlined_call_operand.hbm [shape: f32[128,128], index: 2, kind: output, shape index: {}]  }
   0x1   :  { %8 = vsyncpa [#allocation6], 0 }
   0x2   :  { %9 = vsyncpa [#allocation4], 0  ;;  %s755_s9 = smov [#allocation2]   ;;  %s683_s13 = scalar_lea.hbm %s899_s0, 2048 }
   0x3   :  { %s15_s10 = sshll.u32 %s755_s9, 4  ;;  %p684_p0 = scmp.ne.s32.totalorder %s899_s0, %s683_s13  ;;  %s16_s10 = int_to_ptr.vmem [resolvable:$true] %s15_s10 }
   0x4   :  { %p687_p1 = scmp.lt.u32.totalorder %s683_s13, %s899_s0 }
   0x6   :  { %p689_p2 = pnand %p687_p1, %p684_p0 }
   0x8   :  { %692 = shalt.err (!%p689_p2)
}
   0x9   :  { %s693_s18 = scalar_lea.vmem %s16_s10, 2048  ;;  %p698_p4 = scmp.lt.s32.totalorder %s16_s10, %s16_s10 }
   0xa   :  { %p694_p3 = scmp.ne.s32.totalorder %s16_s10, %s693_s18  ;;  %p699_p5 = scmp.lt.s32.totalorder %s693_s18, %s693_s18 }
   0xc   :  { %p700_p6 = por %p699_p5, %p698_p4 }
   0xe   :  { %p701_p7 = pnand %p700_p6, %p694_p3 }
  0x10   :  { %704 = shalt.err (!%p701_p7)
}
  0x11   :  { %s756_s19 = smov 128   ;;  %s757_s20 = smov 8  }
  0x12   :  { %21 = dma.hbm_to_vmem [thread:$0]  %s899_s0, 2048, %s16_s10, [#allocation3], %s756_s19, %s756_s19, %s757_s20  }
  0x13   :  { %s758_s23 = smov [#allocation5]   ;;  %s705_s27 = scalar_lea.hbm %s900_s1, 2048 }
  0x14   :  { %s27_s24 = sshll.u32 %s758_s23, 4  ;;  %p706_p8 = scmp.ne.s32.totalorder %s900_s1, %s705_s27  ;;  %s28_s24 = int_to_ptr.vmem [resolvable:$true] %s27_s24 }
  0x15   :  { %p709_p9 = scmp.lt.u32.totalorder %s705_s27, %s900_s1 }
  0x17   :  { %p711_p10 = pnand %p709_p9, %p706_p8 }
  0x19   :  { %714 = shalt.err (!%p711_p10)
}
  0x1a   :  { %s715_s4 = scalar_lea.vmem %s28_s24, 2048  ;;  %p720_p12 = scmp.lt.s32.totalorder %s28_s24, %s28_s24 }
  0x1b   :  { %p716_p11 = scmp.ne.s32.totalorder %s28_s24, %s715_s4  ;;  %p721_p13 = scmp.lt.s32.totalorder %s715_s4, %s715_s4 }
  0x1d   :  { %p722_p0 = por %p721_p13, %p720_p12 }
  0x1f   :  { %p723_p1 = pnand %p722_p0, %p716_p11 }
  0x21   :  { %726 = shalt.err (!%p723_p1)
}
  0x22   :  { %s759_s0 = smov 64   ;;  %s760_s5 = smov 4  }
  0x23   :  { %33 = dma.hbm_to_vmem [thread:$0]  %s900_s1, 2048, %s28_s24, [#allocation6], %s759_s0, %s759_s0, %s760_s5  }
  0x24   :  { %749 = dma.done.wait [#allocation3], 2048  }
  0x25   :  { %750 = vsyncadd [#allocation3], 4294965248 }
  0x26   :  { %751 = dma.done.wait [#allocation6], 2048  }
  0x27   :  { %752 = vsyncadd [#allocation6], 4294965248  ;;  %v611_v0 = vld [vmem:[#allocation5 + $0x40] sm:$0xff]   ;;  %v613_v2 = vld [vmem:[#allocation5 + $0x48] sm:$0xff]   ;;  %s761_s1 = smov [#allocation7]  }
  0x28   :  { %v612_v1 = vld [vmem:[#allocation5] sm:$0xff]   ;;  %524 = vmatprep.subr.bf16.mxu0 %v611_v0  ;;  %588 = vmatprep.subr.bf16.mxu1 %v611_v0  ;;  %v614_v3 = vld [vmem:[#allocation5 + $0x8] sm:$0xff]   ;;  %v615_v4 = vld [vmem:[#allocation5 + $0x50] sm:$0xff]   ;;  %s479_s8 = sshll.u32 %s761_s1, 4  ;;  %s480_s8 = int_to_ptr.vmem [resolvable:$true] %s479_s8 }
  0x29   :  { %525 = vmatpush3.bf16.msra.mxu0 %v612_v1  ;;  %596 = vmatpush3.bf16.msra.mxu1 %v612_v1  ;;  %v616_v5 = vld [vmem:[#allocation5 + $0x10] sm:$0xff]   ;;  %v617_v6 = vld [vmem:[#allocation5 + $0x58] sm:$0xff]   ;;  %v619_v8 = vld [vmem:[#allocation5 + $0x60] sm:$0xff]   ;;  %s727_s9 = scalar_lea.vmem %s480_s8, 2048  ;;  %p732_p3 = scmp.lt.s32.totalorder %s480_s8, %s480_s8 }
  0x2a   :  { %526 = vmatprep.subr.bf16.mxu0 %v613_v2  ;;  %589 = vmatprep.subr.bf16.mxu1 %v613_v2  ;;  %v618_v7 = vld [vmem:[#allocation5 + $0x18] sm:$0xff]   ;;  %v620_v9 = vld [vmem:[#allocation5 + $0x20] sm:$0xff]   ;;  %v621_v10 = vld [vmem:[#allocation5 + $0x68] sm:$0xff]   ;;  %p728_p2 = scmp.ne.s32.totalorder %s480_s8, %s727_s9  ;;  %p733_p4 = scmp.lt.s32.totalorder %s727_s9, %s727_s9 }
  0x2b   :  { %v629_v11 = vld [vmem:[#allocation2 + $0x4] ss:$8 sps:$4 sm:$0xff]   ;;  %v623_v14 = vld [vmem:[#allocation5 + $0x70] sm:$0xff]   ;;  %v625_v16 = vld [vmem:[#allocation5 + $0x78] sm:$0xff]  }
  0x2c   :  { %v632_v12 = vld [vmem:[#allocation2 + $0x44] ss:$8 sps:$4 sm:$0xff]   ;;  %297 = vmatprep.mubr.bf16.mxu0 %v629_v11  ;;  %v624_v15 = vld [vmem:[#allocation5 + $0x30] sm:$0xff]   ;;  %v626_v17 = vld [vmem:[#allocation5 + $0x38] sm:$0xff]   ;;  %p734_p5 = por %p733_p4, %p732_p3 }
  0x2d   :  { %527 = vmatpush3.bf16.msra.mxu0 %v614_v3  ;;  %597 = vmatpush3.bf16.msra.mxu1 %v614_v3  ;;  %v622_v13 = vld [vmem:[#allocation5 + $0x28] sm:$0xff]   ;;  %v633_v20 = vld [vmem:[#allocation2 + $0x14] ss:$8 sps:$4 sm:$0xff]   ;;  %v635_v22 = vld [vmem:[#allocation2 + $0x10] ss:$8 sps:$4 sm:$0xff]  }
  0x2e   :  { %528 = vmatprep.subr.bf16.mxu0 %v615_v4  ;;  %590 = vmatprep.subr.bf16.mxu1 %v615_v4  ;;  %v627_v18 = vld [vmem:[#allocation2] ss:$8 sps:$4 sm:$0xff]   ;;  %v636_v21 = vld [vmem:[#allocation2 + $0x54] ss:$8 sps:$4 sm:$0xff]   ;;  %v638_v23 = vld [vmem:[#allocation2 + $0x50] ss:$8 sps:$4 sm:$0xff]   ;;  %p735_p6 = pnand %p734_p5, %p728_p2 }
  0x2f   :  { %329 = vmatprep.mubr.bf16.mxu1 %v632_v12  ;;  %v630_v19 = vld [vmem:[#allocation2 + $0x40] ss:$8 sps:$4 sm:$0xff]   ;;  %v639_v24 = vld [vmem:[#allocation2 + $0x24] ss:$8 sps:$4 sm:$0xff]   ;;  %v645_v28 = vld [vmem:[#allocation2 + $0x34] ss:$8 sps:$4 sm:$0xff]  }
  0x30   :  { %v642_v25 = vld [vmem:[#allocation2 + $0x64] ss:$8 sps:$4 sm:$0xff]   ;;  %v641_v26 = vld [vmem:[#allocation2 + $0x20] ss:$8 sps:$4 sm:$0xff]   ;;  %v648_v29 = vld [vmem:[#allocation2 + $0x74] ss:$8 sps:$4 sm:$0xff]  }
  0x31   :  { %529 = vmatpush3.bf16.msra.mxu0 %v616_v5  ;;  %598 = vmatpush3.bf16.msra.mxu1 %v616_v5  ;;  %v644_v27 = vld [vmem:[#allocation2 + $0x60] ss:$8 sps:$4 sm:$0xff]   ;;  %v647_v30 = vld [vmem:[#allocation2 + $0x30] ss:$8 sps:$4 sm:$0xff]  }
  0x32   :  { %530 = vmatprep.subr.bf16.mxu0 %v617_v6  ;;  %591 = vmatprep.subr.bf16.mxu1 %v617_v6  ;;  %v650_v31 = vld [vmem:[#allocation2 + $0x70] ss:$8 sps:$4 sm:$0xff]  }
  0x35   :  { %531 = vmatpush3.bf16.msra.mxu0 %v618_v7  ;;  %599 = vmatpush3.bf16.msra.mxu1 %v618_v7 }
  0x36   :  { %532 = vmatprep.subr.bf16.mxu0 %v619_v8  ;;  %592 = vmatprep.subr.bf16.mxu1 %v619_v8 }
  0x39   :  { %533 = vmatpush3.bf16.msra.mxu0 %v620_v9  ;;  %600 = vmatpush3.bf16.msra.mxu1 %v620_v9 }
  0x3a   :  { %534 = vmatprep.subr.bf16.mxu0 %v621_v10  ;;  %593 = vmatprep.subr.bf16.mxu1 %v621_v10 }
  0x3d   :  { %535 = vmatpush3.bf16.msra.mxu0 %v622_v13  ;;  %601 = vmatpush3.bf16.msra.mxu1 %v622_v13 }
  0x3e   :  { %536 = vmatprep.subr.bf16.mxu0 %v623_v14  ;;  %594 = vmatprep.subr.bf16.mxu1 %v623_v14 }
  0x41   :  { %537 = vmatpush3.bf16.msra.mxu0 %v624_v15  ;;  %602 = vmatpush3.bf16.msra.mxu1 %v624_v15 }
  0x42   :  { %538 = vmatprep.subr.bf16.mxu0 %v625_v16  ;;  %595 = vmatprep.subr.bf16.mxu1 %v625_v16 }
  0x45   :  { %539 = vmatpush3.bf16.msra.mxu0 %v626_v17  ;;  %603 = vmatpush3.bf16.msra.mxu1 %v626_v17 }
  0x48   :  { %298 = vmatmul.mubr.bf16.vlgmr.msra.gmra.mrb[0].mxu0 %v627_v18  ;;  %330 = vmatmul.mubr.bf16.vlgmr.msra.gmra.mrb[0].mxu1 %v630_v19 }
  0x49   :  { %305 = vmatprep.mubr.bf16.mxu0 %v633_v20  ;;  %337 = vmatprep.mubr.bf16.mxu1 %v636_v21 }
  0x50   :  { %306 = vmatmul.mubr.bf16.gmra.mrb[4].mxu0 %v635_v22  ;;  %338 = vmatmul.mubr.bf16.gmra.mrb[4].mxu1 %v638_v23 }
  0x51   :  { %313 = vmatprep.mubr.bf16.mxu0 %v639_v24  ;;  %345 = vmatprep.mubr.bf16.mxu1 %v642_v25 }
  0x58   :  { %314 = vmatmul.mubr.bf16.gmra.mrb[8].mxu0 %v641_v26  ;;  %346 = vmatmul.mubr.bf16.gmra.mrb[8].mxu1 %v644_v27 }
  0x59   :  { %321 = vmatprep.mubr.bf16.mxu0 %v645_v28  ;;  %353 = vmatprep.mubr.bf16.mxu1 %v648_v29 }
  0x60   :  { %322 = vmatmul.mubr.bf16.gmra.mrb[12].mxu0 %v647_v30  ;;  %354 = vmatmul.mubr.bf16.gmra.mrb[12].mxu1 %v650_v31 }
 0x11b   :  { %v540_v32 = vpop.f32.mrb[0].mxu0  ;;  %v564_v33 = vpop.f32.mrb[0].mxu1 }
 0x11c   :  { %v541_v34 = vpop.f32.mrb[1].mxu0  ;;  %v565_v35 = vpop.f32.mrb[1].mxu1 }
 0x11d   :  { %v804_v36 = vadd.f32 %v541_v34, %v540_v32  ;;  %v806_v37 = vadd.f32 %v565_v35, %v564_v33  ;;  %v543_v38 = vpop.f32.mrb[2].mxu0  ;;  %v567_v39 = vpop.f32.mrb[2].mxu1 }
 0x11e   :  { %v544_v40 = vpop.f32.mrb[3].mxu0  ;;  %v568_v41 = vpop.f32.mrb[3].mxu1 }
 0x11f   :  { %v808_v42 = vadd.f32 %v544_v40, %v543_v38  ;;  %v810_v43 = vadd.f32 %v568_v41, %v567_v39  ;;  %v362_v44 = vmul.f32 %v804_v36, %v804_v36  ;;  %v370_v47 = vmul.f32 %v806_v37, %v806_v37 }
 0x121   :  { %378 = vadd.xlane.f32.xlu0 %v362_v44  ;;  %v371_v45 = vmul.f32 %v810_v43, %v810_v43  ;;  %v363_v60 = vmul.f32 %v808_v42, %v808_v42 }
 0x123   :  { %396 = vadd.xlane.f32.xlu1 %v371_v45  ;;  %v546_v46 = vpop.f32.mrb[4].mxu0  ;;  %v570_v48 = vpop.f32.mrb[4].mxu1 }
 0x124   :  { %v547_v49 = vpop.f32.mrb[5].mxu0  ;;  %v571_v50 = vpop.f32.mrb[5].mxu1 }
 0x125   :  { %v818_v51 = vadd.f32 %v547_v49, %v546_v46  ;;  %v549_v52 = vpop.f32.mrb[6].mxu0  ;;  %394 = vadd.xlane.f32.xlu0 %v370_v47  ;;  %v820_v53 = vadd.f32 %v571_v50, %v570_v48  ;;  %v573_v54 = vpop.f32.mrb[6].mxu1 }
 0x126   :  { %v550_v55 = vpop.f32.mrb[7].mxu0  ;;  %v574_v56 = vpop.f32.mrb[7].mxu1 }
 0x127   :  { %v822_v57 = vadd.f32 %v550_v55, %v549_v52  ;;  %v824_v58 = vadd.f32 %v574_v56, %v573_v54  ;;  %v364_v59 = vmul.f32 %v818_v51, %v818_v51  ;;  %v372_v61 = vmul.f32 %v820_v53, %v820_v53 }
 0x129   :  { %382 = vadd.xlane.f32.xlu1 %v364_v59  ;;  %380 = vadd.xlane.f32.xlu0 %v363_v60  ;;  %v365_v63 = vmul.f32 %v822_v57, %v822_v57  ;;  %v373_v11 = vmul.f32 %v824_v58, %v824_v58 }
 0x12b   :  { %v552_v62 = vpop.f32.mrb[8].mxu0  ;;  %v576_v0 = vpop.f32.mrb[8].mxu1 }
 0x12c   :  { %v553_v1 = vpop.f32.mrb[9].mxu0  ;;  %v577_v2 = vpop.f32.mrb[9].mxu1 }
 0x12d   :  { %v834_v3 = vadd.f32 %v553_v1, %v552_v62  ;;  %v555_v4 = vpop.f32.mrb[10].mxu0  ;;  %384 = vadd.xlane.f32.xlu1 %v365_v63  ;;  %398 = vadd.xlane.f32.xlu0 %v372_v61  ;;  %v836_v5 = vadd.f32 %v577_v2, %v576_v0  ;;  %v579_v6 = vpop.f32.mrb[10].mxu1 }
 0x12e   :  { %v556_v7 = vpop.f32.mrb[11].mxu0  ;;  %v580_v8 = vpop.f32.mrb[11].mxu1 }
 0x12f   :  { %v838_v9 = vadd.f32 %v556_v7, %v555_v4  ;;  %v840_v10 = vadd.f32 %v580_v8, %v579_v6  ;;  %v366_v12 = vmul.f32 %v834_v3, %v834_v3  ;;  %v374_v13 = vmul.f32 %v836_v5, %v836_v5 }
 0x131   :  { %400 = vadd.xlane.f32.xlu1 %v373_v11  ;;  %386 = vadd.xlane.f32.xlu0 %v366_v12  ;;  %v367_v15 = vmul.f32 %v838_v9, %v838_v9  ;;  %v375_v27 = vmul.f32 %v840_v10, %v840_v10 }
 0x133   :  { %v558_v14 = vpop.f32.mrb[12].mxu0  ;;  %v582_v16 = vpop.f32.mrb[12].mxu1 }
 0x134   :  { %v559_v17 = vpop.f32.mrb[13].mxu0  ;;  %v583_v18 = vpop.f32.mrb[13].mxu1 }
 0x135   :  { %v850_v19 = vadd.f32 %v559_v17, %v558_v14  ;;  %v561_v20 = vpop.f32.mrb[14].mxu0  ;;  %388 = vadd.xlane.f32.xlu1 %v367_v15  ;;  %402 = vadd.xlane.f32.xlu0 %v374_v13  ;;  %v852_v21 = vadd.f32 %v583_v18, %v582_v16  ;;  %v585_v22 = vpop.f32.mrb[14].mxu1 }
 0x136   :  { %v562_v23 = vpop.f32.mrb[15].mxu0  ;;  %v586_v24 = vpop.f32.mrb[15].mxu1 }
 0x137   :  { %v854_v25 = vadd.f32 %v562_v23, %v561_v20  ;;  %v856_v26 = vadd.f32 %v586_v24, %v585_v22  ;;  %v368_v28 = vmul.f32 %v850_v19, %v850_v19  ;;  %v376_v29 = vmul.f32 %v852_v21, %v852_v21 }
 0x139   :  { %404 = vadd.xlane.f32.xlu1 %v375_v27  ;;  %390 = vadd.xlane.f32.xlu0 %v368_v28  ;;  %v369_v30 = vmul.f32 %v854_v25, %v854_v25  ;;  %v377_v31 = vmul.f32 %v856_v26, %v856_v26 }
 0x13d   :  { %392 = vadd.xlane.f32.xlu1 %v369_v30  ;;  %406 = vadd.xlane.f32.xlu0 %v376_v29 }
 0x141   :  { %408 = vadd.xlane.f32.xlu1 %v377_v31 }
 0x1ae   :  { %v379_v32 = vpop.xlane.xlu0 %378 }
 0x1af   :  { %v410_v33 = vadd.f32 1e-12, %v379_v32 }
 0x1b0   :  { %v397_v34 = vpop.xlane.xlu1 %396 }
 0x1b1   :  { %651 = vrsqrt.f32 %v410_v33  ;;  %v419_v35 = vadd.f32 1e-12, %v397_v34 }
 0x1b2   :  { %v395_v38 = vpop.xlane.xlu0 %394 }
 0x1b3   :  { %653 = vrsqrt.f32 %v419_v35  ;;  %v418_v39 = vadd.f32 1e-12, %v395_v38 }
 0x1b5   :  { %655 = vrsqrt.f32 %v418_v39 }
 0x1b6   :  { %v383_v40 = vpop.xlane.xlu1 %382  ;;  %v381_v41 = vpop.xlane.xlu0 %380 }
 0x1b7   :  { %v412_v44 = vadd.f32 1e-12, %v383_v40  ;;  %v411_v45 = vadd.f32 1e-12, %v381_v41 }
 0x1b9   :  { %657 = vrsqrt.f32 %v412_v44 }
 0x1ba   :  { %659 = vrsqrt.f32 %v411_v45  ;;  %v385_v46 = vpop.xlane.xlu1 %384  ;;  %v399_v47 = vpop.xlane.xlu0 %398 }
 0x1bb   :  { %v652_v48 = vpop.eup %651  ;;  %v413_v49 = vadd.f32 1e-12, %v385_v46  ;;  %v420_v50 = vadd.f32 1e-12, %v399_v47 }
 0x1bc   :  { %v442_v52 = vmul.f32 %v652_v48, %v804_v36 }
 0x1bd   :  { %v654_v54 = vpop.eup %653  ;;  %661 = vrsqrt.f32 %v413_v49 }
 0x1be   :  { %458 = vst [vmem:[#allocation7] sm:$0xff] %v442_v52  ;;  %v451_v55 = vmul.f32 %v654_v54, %v810_v43  ;;  %663 = vrsqrt.f32 %v420_v50  ;;  %v401_v56 = vpop.xlane.xlu1 %400  ;;  %v387_v59 = vpop.xlane.xlu0 %386 }
 0x1bf   :  { %v656_v60 = vpop.eup %655  ;;  %v421_v61 = vadd.f32 1e-12, %v401_v56  ;;  %v414_v62 = vadd.f32 1e-12, %v387_v59 }
 0x1c0   :  { %467 = vst [vmem:[#allocation7 + $0x48] sm:$0xff] %v451_v55  ;;  %v450_v63 = vmul.f32 %v656_v60, %v806_v37 }
 0x1c1   :  { %665 = vrsqrt.f32 %v421_v61 }
 0x1c2   :  { %466 = vst [vmem:[#allocation7 + $0x40] sm:$0xff] %v450_v63  ;;  %667 = vrsqrt.f32 %v414_v62  ;;  %v389_v0 = vpop.xlane.xlu1 %388  ;;  %v403_v1 = vpop.xlane.xlu0 %402 }
 0x1c3   :  { %v658_v36 = vpop.eup %657  ;;  %v415_v2 = vadd.f32 1e-12, %v389_v0  ;;  %v422_v4 = vadd.f32 1e-12, %v403_v1 }
 0x1c4   :  { %v660_v6 = vpop.eup %659  ;;  %v444_v43 = vmul.f32 %v658_v36, %v818_v51 }
 0x1c5   :  { %v443_v7 = vmul.f32 %v660_v6, %v808_v42  ;;  %669 = vrsqrt.f32 %v415_v2 }
 0x1c6   :  { %460 = vst [vmem:[#allocation7 + $0x10] sm:$0xff] %v444_v43  ;;  %671 = vrsqrt.f32 %v422_v4  ;;  %v405_v8 = vpop.xlane.xlu1 %404  ;;  %v391_v11 = vpop.xlane.xlu0 %390 }
 0x1c7   :  { %v662_v12 = vpop.eup %661  ;;  %459 = vst [vmem:[#allocation7 + $0x8] sm:$0xff] %v443_v7  ;;  %v423_v37 = vadd.f32 1e-12, %v405_v8  ;;  %v416_v13 = vadd.f32 1e-12, %v391_v11 }
 0x1c8   :  { %v664_v14 = vpop.eup %663  ;;  %v445_v15 = vmul.f32 %v662_v12, %v822_v57 }
 0x1c9   :  { %v452_v16 = vmul.f32 %v664_v14, %v820_v53  ;;  %673 = vrsqrt.f32 %v423_v37 }
 0x1ca   :  { %461 = vst [vmem:[#allocation7 + $0x18] sm:$0xff] %v445_v15  ;;  %675 = vrsqrt.f32 %v416_v13  ;;  %v393_v51 = vpop.xlane.xlu1 %392  ;;  %v407_v17 = vpop.xlane.xlu0 %406 }
 0x1cb   :  { %v666_v42 = vpop.eup %665  ;;  %468 = vst [vmem:[#allocation7 + $0x50] sm:$0xff] %v452_v16  ;;  %v417_v18 = vadd.f32 1e-12, %v393_v51  ;;  %v424_v20 = vadd.f32 1e-12, %v407_v17 }
 0x1cc   :  { %v668_v22 = vpop.eup %667  ;;  %v453_v23 = vmul.f32 %v666_v42, %v824_v58 }
 0x1cd   :  { %v446_v24 = vmul.f32 %v668_v22, %v834_v3  ;;  %677 = vrsqrt.f32 %v417_v18 }
 0x1ce   :  { %469 = vst [vmem:[#allocation7 + $0x58] sm:$0xff] %v453_v23  ;;  %679 = vrsqrt.f32 %v424_v20  ;;  %v409_v57 = vpop.xlane.xlu1 %408 }
 0x1cf   :  { %v670_v27 = vpop.eup %669  ;;  %462 = vst [vmem:[#allocation7 + $0x20] sm:$0xff] %v446_v24  ;;  %v425_v53 = vadd.f32 1e-12, %v409_v57 }
 0x1d0   :  { %v672_v28 = vpop.eup %671  ;;  %v447_v29 = vmul.f32 %v670_v27, %v838_v9 }
 0x1d1   :  { %v454_v30 = vmul.f32 %v672_v28, %v836_v5  ;;  %681 = vrsqrt.f32 %v425_v53 }
 0x1d2   :  { %463 = vst [vmem:[#allocation7 + $0x28] sm:$0xff] %v447_v29 }
 0x1d3   :  { %v674_v31 = vpop.eup %673  ;;  %470 = vst [vmem:[#allocation7 + $0x60] sm:$0xff] %v454_v30 }
 0x1d4   :  { %v676_v32 = vpop.eup %675  ;;  %v455_v58 = vmul.f32 %v674_v31, %v840_v10 }
 0x1d5   :  { %v448_v3 = vmul.f32 %v676_v32, %v850_v19 }
 0x1d6   :  { %471 = vst [vmem:[#allocation7 + $0x68] sm:$0xff] %v455_v58 }
 0x1d7   :  { %v678_v33 = vpop.eup %677  ;;  %464 = vst [vmem:[#allocation7 + $0x30] sm:$0xff] %v448_v3 }
 0x1d8   :  { %v680_v34 = vpop.eup %679  ;;  %v449_v35 = vmul.f32 %v678_v33, %v854_v25 }
 0x1d9   :  { %v456_v38 = vmul.f32 %v680_v34, %v852_v21 }
 0x1da   :  { %465 = vst [vmem:[#allocation7 + $0x38] sm:$0xff] %v449_v35 }
 0x1db   :  { %v682_v5 = vpop.eup %681  ;;  %472 = vst [vmem:[#allocation7 + $0x70] sm:$0xff] %v456_v38 }
 0x1dc   :  { %v457_v9 = vmul.f32 %v682_v5, %v856_v26 }
 0x1de   :  { %473 = vst [vmem:[#allocation7 + $0x78] sm:$0xff] %v457_v9 }
 0x1df   :  { %738 = shalt.err (!%p735_p6)
}
 0x1e0   :  { %s739_s12 = scalar_lea.hbm %s901_s2, 2048 }
 0x1e1   :  { %p740_p7 = scmp.ne.s32.totalorder %s901_s2, %s739_s12  ;;  %p743_p8 = scmp.lt.u32.totalorder %s739_s12, %s901_s2 }
 0x1e3   :  { %p745_p9 = pnand %p743_p8, %p740_p7 }
 0x1e5   :  { %748 = shalt.err (!%p745_p9)
}
 0x1e6   :  { %485 = dma.vmem_to_hbm [thread:$0]  %s480_s8, 2048, %s901_s2, [#allocation4], %s756_s19, %s756_s19, %s757_s20  }
 0x1e7   :  { %753 = dma.done.wait [#allocation4], 2048  }
 0x1e8   :  { %754 = vsyncadd [#allocation4], 4294965248 }
 0x1e9   :  { %489 = vsyncpa [#allocation3], 1 }
 0x1ea   :  { %490 = vsyncpa [#allocation6], 1 }
 0x1eb   :  { %491 = vsyncpa [#allocation4], 1 }

// kernel: tent_forward.3
= control target key start
LH: loop header
LB: loop body
LE: loop exit
PB: predicated region body
PF: predicated region fallthrough
CT: control target
= control target key end

     0   :  { %12 = vsyncpa [#allocation4], 0  ;;  %s2454_s0 = inlined_call_operand.hbm [shape: bf16[8,1024], index: 0, kind: input, shape index: {}]   ;;  %s2455_s1 = inlined_call_operand.hbm [shape: bf16[1024,128], index: 1, kind: input, shape index: {}]   ;;  %s2456_s2 = inlined_call_operand.hbm [shape: f32[128,128], index: 2, kind: input, shape index: {}]   ;;  %s2457_s3 = inlined_call_operand.hbm [shape: bf16[256,128], index: 3, kind: input, shape index: {}]   ;;  %s2458_s4 = inlined_call_operand.hbm [shape: f32[128,256], index: 4, kind: input, shape index: {}]   ;;  %s2459_s5 = inlined_call_operand.hbm [shape: f32[8,128], index: 5, kind: output, shape index: {0}]   ;;  %s2460_s6 = inlined_call_operand.hbm [shape: f32[1,1], index: 6, kind: output, shape index: {1}]  }
   0x1   :  { %14 = vsyncpa [#allocation4 + $0x1], 0 }
   0x2   :  { %15 = vsyncpa [#allocation8], 0 }
   0x3   :  { %17 = vsyncpa [#allocation8 + $0x1], 0 }
   0x4   :  { %18 = vsyncpa [#allocation11], 0 }
   0x5   :  { %19 = vsyncpa [#allocation5], 0 }
   0x6   :  { %20 = vsyncpa [#allocation6], 0  ;;  %s2094_s21 = smov 0   ;;  %s2096_s22 = smov 0  }
   0x7   :  { %s2098_s23 = smov 0   ;;  %s2100_s24 = smov 0  }
   0x8 LB: > { %s2113_s25 = sadd.s32 4294967295, %s2040_s24   ;;  %p46_p0 = scmp.ne.s32.totalorder %s2032_s22, %s2028_s21  ;;  %s2040_s24 = sphi %s2100_s24, %s2481_s24   ;;  %s2036_s23 = sphi %s2098_s23, %s2480_s23   ;;  %s2032_s22 = sphi %s2096_s22, %s2479_s22   ;;  %s2028_s21 = sphi %s2094_s21, %s2478_s21  }
   0x9   : > { %p2461_p1 = scmp.eq.s32.totalorder %s2113_s25, 0  ;;  %p1416_p2 = scmp.ge.s32.totalorder %s2040_s24, 1 }
   0xa   : > { %p188_p3 = scmp.lt.s32.totalorder %s2040_s24, 5  ;;  %s2042_s28 = smov [#allocation9]  }
   0xb   : > { %p2122_p5 = por %p2461_p1, %p46_p0  ;;  %s200_s29 = sshll.u32 %s2042_s28, 4  ;;  %s201_s29 = int_to_ptr.vmem [resolvable:$true] %s200_s29 }
   0xc   : > { %p2126_p6 = pnand %p1416_p2, %p188_p3  ;;  %s2043_s7 = smov [#allocation10]  }
   0xd   : > { %s2465_s26 = scalar_select %p2122_p5, 1, 0 }
   0xe   : > { %s2466_s27 = scalar_select %p2126_p6, 1, 0 }
   0xf   : > { %p1683_p7 = pneg %p2126_p6  ;;  %s213_s8 = sshll.u32 %s2043_s7, 4  ;;  %s2138_s8 = int_to_ptr.vmem [resolvable:$true] %s213_s8 }
  0x10   : > { %s1804_s11 = scalar_lea.hbm %s2456_s2, 2048 }
  0x11   : > { %p2134_p8 = pnand %p1683_p7, %p2461_p1  ;;  %p1805_p9 = scmp.ne.s32.totalorder %s2456_s2, %s1804_s11 }
  0x12   : > { %p1811_p13 = scmp.lt.u32.totalorder %s1804_s11, %s2456_s2 }
  0x13   : > { %p2148_p10 = pneg %p2134_p8 }
  0x15   : > { %p1807_p11 = pnand %p2148_p10, %p1805_p9 }
  0x17   : > { %p1808_p12 = pneg %p1807_p11 }
  0x19   : > { %p1813_p0 = pnand %p1811_p13, %p1808_p12 }
  0x1b   : > { %1816 = shalt.err (!%p1813_p0)
}
  0x1c   : > { %s1817_s17 = scalar_lea.vmem %s201_s29, 2048  ;;  %p1825_p4 = scmp.lt.s32.totalorder %s201_s29, %s201_s29 }
  0x1d   : > { %p1818_p2 = scmp.ne.s32.totalorder %s201_s29, %s1817_s17  ;;  %p1826_p1 = scmp.lt.s32.totalorder %s1817_s17, %s1817_s17 }
  0x1f   : > { %p1820_p3 = pnand %p1818_p2, %p2148_p10  ;;  %p1827_p5 = por %p1826_p1, %p1825_p4 }
  0x21   : > { %p1821_p7 = pneg %p1820_p3 }
  0x23   : > { %p1828_p6 = pnand %p1827_p5, %p1821_p7 }
  0x25   : > { %1831 = shalt.err (!%p1828_p6)
}
  0x26   : > { %s2044_s18 = smov 128   ;;  %s2045_s19 = smov 8  }
  0x27   : > { %1686 = dma.hbm_to_vmem [thread:$0]  (!%p2134_p8), %s2456_s2, 2048, %s201_s29, [#allocation8], %s2044_s18, %s2044_s18, %s2045_s19  }
  0x28   : > { %s1832_s9 = scalar_lea.hbm %s2457_s3, 2048 }
  0x29   : > { %p1833_p9 = scmp.ne.s32.totalorder %s2457_s3, %s1832_s9  ;;  %p1839_p5 = scmp.lt.u32.totalorder %s1832_s9, %s2457_s3 }
  0x2b   : > { %p1835_p1 = pnand %p1833_p9, %p2148_p10 }
  0x2d   : > { %p1836_p4 = pneg %p1835_p1 }
  0x2f   : > { %p1841_p6 = pnand %p1839_p5, %p1836_p4 }
  0x31   : > { %1844 = shalt.err (!%p1841_p6)
}
  0x32   : > { %s1845_s29 = scalar_lea.vmem %s2138_s8, 2048  ;;  %p1853_p0 = scmp.lt.s32.totalorder %s2138_s8, %s2138_s8 }
  0x33   : > { %p1846_p11 = scmp.ne.s32.totalorder %s2138_s8, %s1845_s29  ;;  %p1854_p2 = scmp.lt.s32.totalorder %s1845_s29, %s1845_s29 }
  0x35   : > { %p1848_p12 = pnand %p1846_p11, %p2148_p10  ;;  %p1855_p3 = por %p1854_p2, %p1853_p0 }
  0x37   : > { %p1849_p13 = pneg %p1848_p12 }
  0x39   : > { %p1856_p7 = pnand %p1855_p3, %p1849_p13 }
  0x3b   : > { %1859 = shalt.err (!%p1856_p7)
}
  0x3c   : > { %s2464_s15 = smov 64   ;;  %s2047_s16 = smov 4  }
  0x3d   : > { %1689 = dma.hbm_to_vmem [thread:$0]  (!%p2134_p8), %s2457_s3, 2048, %s2138_s8, [#allocation11], %s2464_s15, %s2464_s15, %s2047_s16  }
  0x3e   : > { %s2048_s19 = smov [#allocation12]   ;;  %s1860_s7 = scalar_lea.hbm %s2458_s4, 4096 }
  0x3f   : > { %s226_s20 = sshll.u32 %s2048_s19, 4  ;;  %p1861_p9 = scmp.ne.s32.totalorder %s2458_s4, %s1860_s7  ;;  %s227_s20 = int_to_ptr.vmem [resolvable:$true] %s226_s20 }
  0x40   : > { %p1867_p5 = scmp.lt.u32.totalorder %s1860_s7, %s2458_s4 }
  0x41   : > { %p1863_p1 = pnand %p1861_p9, %p2148_p10 }
  0x43   : > { %p1864_p4 = pneg %p1863_p1 }
  0x45   : > { %p1869_p6 = pnand %p1867_p5, %p1864_p4 }
  0x47   : > { %1872 = shalt.err (!%p1869_p6)
}
  0x48   : > { %s1873_s8 = scalar_lea.vmem %s227_s20, 4096  ;;  %p1881_p0 = scmp.lt.s32.totalorder %s227_s20, %s227_s20 }
  0x49   : > { %p1874_p11 = scmp.ne.s32.totalorder %s227_s20, %s1873_s8  ;;  %p1882_p2 = scmp.lt.s32.totalorder %s1873_s8, %s1873_s8 }
  0x4b   : > { %p1876_p12 = pnand %p1874_p11, %p2148_p10  ;;  %p1883_p3 = por %p1882_p2, %p1881_p0 }
  0x4d   : > { %p1877_p13 = pneg %p1876_p12 }
  0x4f   : > { %p1884_p7 = pnand %p1883_p3, %p1877_p13 }
  0x51   : > { %1887 = shalt.err (!%p1884_p7)
}
  0x52   : > { %s2049_s13 = smov 256   ;;  %s2050_s14 = smov 16  }
  0x53   : > { %1692 = dma.hbm_to_vmem [thread:$0]  (!%p2134_p8), %s2458_s4, 4096, %s227_s20, [#allocation11], %s2049_s13, %s2049_s13, %s2050_s14  }
  0x54   : > { %s2209_s18 = sadd.s32 1, %s2040_s24   ;;  %s33_s21 = sadd.s32 1, %s2036_s23 }
  0x55   : > { %s30_s19 = ssub.s32 %s2040_s24, %s2209_s18  ;;  %p40_p9 = scmp.ne.s32.totalorder %s2036_s23, %s2032_s22 }
  0x56   : > { %p31_p10 = scmp.eq.s32.totalorder %s30_s19, 0  ;;  %p41_p1 = scmp.eq.s32.totalorder %s2040_s24, 0 }
  0x57   : > { %p1703_p4 = scmp.lt.s32.totalorder %s2040_s24, 4  ;;  %s2222_s7 = sand.u32 1, %s2036_s23  }
  0x58   : > { %s2219_s28 = scalar_select %p31_p10, %s2036_s23, %s33_s21  }
  0x59   : > { %p42_p5 = por %p41_p1, %p40_p9  ;;  %s1421_s30 = sshll.u32 %s2222_s7, 3 }
  0x5a   : > { %s1480_s20 = sshll.u32 %s2040_s24, 7  ;;  %s244_s12 = scalar_lea.vmem [#allocation3], %s1421_s30 }
  0x5b   : > { %s2229_s11 = scalar_lea.hbm %s2454_s0, %s1480_s20  ;;  %s252_s8 = sshll.u32 %s244_s12, 4  ;;  %s2231_s8 = int_to_ptr.vmem [resolvable:$true] %s252_s8 }
  0x5c   : > { %p2233_p8 = pnand %p1703_p4, %p42_p5  ;;  %s1424_s14 = sshll.u32 %s2222_s7, 7 }
  0x5d   : > { %s259_s29 = sand.u32 1, %s2040_s24   ;;  %s241_s17 = scalar_lea.sflag [#allocation4], %s2222_s7 }
  0x5e   : > { %s1888_s19 = scalar_lea.hbm %s2229_s11, 128  ;;  %p1890_p11 = pneg %p2233_p8 }
  0x5f   : > { %p1889_p6 = scmp.ne.s32.totalorder %s2229_s11, %s1888_s19  ;;  %s1893_s20 = scalar_lea.hbm %s2454_s0, 512 }
  0x60   : > { %p1894_p0 = scmp.lt.u32.totalorder %s2229_s11, %s2454_s0  ;;  %p1895_p2 = scmp.lt.u32.totalorder %s1893_s20, %s1888_s19 }
  0x61   : > { %p1891_p12 = pnand %p1890_p11, %p1889_p6  ;;  %p1897_p7 = scmp.lt.u32.totalorder %s1888_s19, %s2229_s11 }
  0x62   : > { %p1896_p3 = por %p1895_p2, %p1894_p0 }
  0x63   : > { %p1892_p13 = pneg %p1891_p12 }
  0x64   : > { %p1898_p10 = por %p1897_p7, %p1896_p3 }
  0x66   : > { %p1899_p9 = pnand %p1898_p10, %p1892_p13 }
  0x68   : > { %1902 = shalt.err (!%p1899_p9)
}
  0x69   : > { %s1903_s12 = scalar_lea.vmem %s2231_s8, 128  ;;  %s2051_s21 = smov [#allocation3]  }
  0x6a   : > { %p1904_p1 = scmp.ne.s32.totalorder %s2231_s8, %s1903_s12  ;;  %s1908_s30 = sshll.u32 %s2051_s21, 4  ;;  %s1909_s30 = int_to_ptr.vmem [resolvable:$false] %s1908_s30 }
  0x6b   : > { %s1910_s9 = scalar_lea.vmem %s1909_s30, 256  ;;  %p1911_p6 = scmp.lt.s32.totalorder %s2231_s8, %s1909_s30 }
  0x6c   : > { %p1906_p4 = pnand %p1904_p1, %p1890_p11  ;;  %p1912_p12 = scmp.lt.s32.totalorder %s1910_s9, %s1903_s12 }
  0x6e   : > { %p1907_p5 = pneg %p1906_p4  ;;  %p1913_p0 = por %p1912_p12, %p1911_p6 }
  0x70   : > { %p1914_p2 = pnand %p1913_p0, %p1907_p5 }
  0x72   : > { %1917 = shalt.err (!%p1914_p2)
}
  0x73   : > { %1696 = dma.hbm_to_vmem [thread:$0]  (!%p2233_p8), %s2229_s11, 128, %s2231_s8, %s241_s17  }
  0x74   : > { %s263_s19 = scalar_lea.vmem [#allocation7], %s1424_s14  ;;  %s1481_s10 = sshll.u32 %s2040_s24, 11 }
  0x75   : > { %s270_s20 = sshll.u32 %s263_s19, 4  ;;  %s2273_s30 = scalar_lea.hbm %s2455_s1, %s1481_s10  ;;  %s2267_s20 = int_to_ptr.vmem [resolvable:$true] %s270_s20 }
  0x76   : > { %s2277_s9 = scalar_lea.sflag [#allocation8], %s259_s29  ;;  %s1918_s15 = scalar_lea.hbm %s2273_s30, 2048 }
  0x77   : > { %p1919_p13 = scmp.ne.s32.totalorder %s2273_s30, %s1918_s15  ;;  %s1923_s8 = scalar_lea.hbm %s2455_s1, 8192 }
  0x78   : > { %p1924_p10 = scmp.lt.u32.totalorder %s2273_s30, %s2455_s1  ;;  %p1925_p9 = scmp.lt.u32.totalorder %s1923_s8, %s1918_s15 }
  0x79   : > { %p1921_p3 = pnand %p1919_p13, %p1890_p11  ;;  %p1927_p4 = scmp.lt.u32.totalorder %s1918_s15, %s2273_s30 }
  0x7a   : > { %p1926_p1 = por %p1925_p9, %p1924_p10 }
  0x7b   : > { %p1922_p7 = pneg %p1921_p3 }
  0x7c   : > { %p1928_p5 = por %p1927_p4, %p1926_p1 }
  0x7e   : > { %p1929_p6 = pnand %p1928_p5, %p1922_p7 }
  0x80   : > { %1932 = shalt.err (!%p1929_p6)
}
  0x81   : > { %s1933_s24 = scalar_lea.vmem %s2267_s20, 2048  ;;  %s2052_s29 = smov [#allocation7]  }
  0x82   : > { %p1934_p12 = scmp.ne.s32.totalorder %s2267_s20, %s1933_s24  ;;  %s1938_s19 = sshll.u32 %s2052_s29, 4  ;;  %s1939_s19 = int_to_ptr.vmem [resolvable:$false] %s1938_s19 }
  0x83   : > { %s1940_s10 = scalar_lea.vmem %s1939_s19, 4096  ;;  %p1941_p13 = scmp.lt.s32.totalorder %s2267_s20, %s1939_s19 }
  0x84   : > { %p1936_p0 = pnand %p1934_p12, %p1890_p11  ;;  %p1942_p3 = scmp.lt.s32.totalorder %s1940_s10, %s1933_s24 }
  0x86   : > { %p1937_p2 = pneg %p1936_p0  ;;  %p1943_p10 = por %p1942_p3, %p1941_p13 }
  0x88   : > { %p1944_p9 = pnand %p1943_p10, %p1937_p2 }
  0x8a   : > { %1947 = shalt.err (!%p1944_p9)
}
  0x8b   : > { %s2470_s15 = smov 64   ;;  %p2471_p11 = scmp.ne.s32.totalorder %s2466_s27, 0 }
  0x8c   : > { %1699 = dma.hbm_to_vmem [thread:$0]  (!%p2233_p8), %s2273_s30, 2048, %s2267_s20, %s2277_s9, %s2470_s15, %s2470_s15, %s2047_s16  }
  0x8d   : > { %282 = sbr.rel (%p2471_p11) target bundleno = 4385 (0x1121), region = 40  ;;  %s284_s21 = sand.u32 (!%p2471_p11), 1, %s2032_s22  }
  0x8e   : > { %s1428_s12 = sshll.u32 (!%p2471_p11), %s284_s21, 3  ;;  %s285_s7 = scalar_lea.sflag (!%p2471_p11), [#allocation4], %s284_s21 }
  0x8f   : > { %s2309_s11 = scalar_lea.vmem (!%p2471_p11), [#allocation3], %s1428_s12  ;;  %p2472_p7 = scmp.ne.s32.totalorder (!%p2471_p11), %s2465_s26, 0 }
  0x94   : > { %2003 = dma.done.wait (%p2472_p7), %s285_s7, 128  }
  0x95   : > { %2005 = vsyncadd (%p2472_p7), %s285_s7, 4294967168  ;;  %s293_s13 = sand.u32 1, %s2113_s25   ;;  %s1429_s8 = sshll.u32 %s284_s21, 7 }
  0x96   : > { %s294_s16 = scalar_lea.sflag [#allocation8], %s293_s13  ;;  %s2316_s20 = scalar_lea.vmem [#allocation7], %s1429_s8 }
  0x97   : > { %2007 = dma.done.wait (%p2472_p7), %s294_s16, 2048  }
  0x98   : > { %2009 = vsyncadd (%p2472_p7), %s294_s16, 4294965248  ;;  %p2473_p8 = scmp.eq.s32.totalorder %s2113_s25, 0 }
  0x9a   : > { %2011 = dma.done.wait (%p2473_p8), [#allocation8], 2048   ;;  %p2474_p1 = pmov %p2473_p8 }
  0x9c   : > { %2013 = vsyncadd (%p2474_p1), [#allocation8], 4294965248  ;;  %p2475_p4 = pmov %p2474_p1 }
  0x9d   : > { %p2476_p5 = pmov %p2474_p1 }
  0x9e   : > { %2015 = dma.done.wait (%p2475_p4), [#allocation11], 6144  }
  0x9f   : > { %2017 = vsyncadd (%p2476_p5), [#allocation11], 4294961152  ;;  %p2477_p6 = scmp.ne.s32.totalorder %s2113_s25, 0 }
  0xa0   : > { %v2053_v0 = vmov (!%p2477_p6), 0.0  }
  0xa1   : > { %344 = sbr.rel (%p2477_p6) target bundleno = 168 (0xa8), region = 64  ;;  %345 = vst [vmem:[#allocation2] sm:$0xff] (!%p2477_p6), %v2053_v0 }
  0xa8 PF: > { %v1758_v1 = vld [vmem:[%s2316_s20 + $0x40] sm:$0xff]   ;;  %v1760_v3 = vld [vmem:[%s2316_s20 + $0x48] sm:$0xff]   ;;  %v1762_v5 = vld [vmem:[%s2316_s20 + $0x50] sm:$0xff]   ;;  %p1452_p12 = scmp.ne.s32.totalorder %s2113_s25, 3 }
  0xa9   : > { %v1759_v2 = vld [vmem:[%s2316_s20] sm:$0xff]   ;;  %1482 = vmatprep.subr.bf16.mxu0 %v1758_v1  ;;  %v1761_v4 = vld [vmem:[%s2316_s20 + $0x8] sm:$0xff]   ;;  %v1763_v6 = vld [vmem:[%s2316_s20 + $0x10] sm:$0xff]   ;;  %v2054_v31 = vmov (!%p1452_p12), 0.0|0.0   ;;  %vm2055_vm0 = vmmov (!%p1452_p12), 0   ;;  %v2056_v41 = vmov (!%p1452_p12), 0.0   ;;  %v624_v59 = vlaneseq (!%p1452_p12) }
  0xaa   : > { %1483 = vmatpush3.bf16.msra.mxu0 %v1759_v2  ;;  %v1764_v7 = vld [vmem:[%s2316_s20 + $0x58] sm:$0xff]   ;;  %v1766_v9 = vld [vmem:[%s2316_s20 + $0x60] sm:$0xff]   ;;  %v1768_v11 = vld [vmem:[%s2316_s20 + $0x68] sm:$0xff]   ;;  %838 = vmatprep.mubr.f32.mxu1 (!%p1452_p12), %v2056_v41 }
  0xab   : > { %1484 = vmatprep.subr.bf16.mxu0 %v1760_v3  ;;  %v1765_v8 = vld [vmem:[%s2316_s20 + $0x18] sm:$0xff]   ;;  %v1767_v10 = vld [vmem:[%s2316_s20 + $0x20] sm:$0xff]   ;;  %v1769_v14 = vld [vmem:[%s2316_s20 + $0x28] sm:$0xff]   ;;  %v2359_v60 = vand.u32 (!%p1452_p12), 127, %v624_v59 }
  0xac   : > { %v347_v12 = vld [vmem:[%s2309_s11] sm:$0xff]  ;;  %v346_v21 = vld [vmem:[#allocation2] sm:$0xff]  ;;  %v536_v28 = vld [vmem:[#allocation9] sm:$0xff] (!%p1452_p12) }
  0xad   : > { %v1435_v13 = vcombine.high %v347_v12, %v347_v12  ;;  %v1770_v15 = vld [vmem:[%s2316_s20 + $0x70] sm:$0xff]   ;;  %v1772_v17 = vld [vmem:[%s2316_s20 + $0x78] sm:$0xff]   ;;  %v1434_v19 = vcombine.low %v347_v12, %v347_v12  ;;  %v537_v29 = vld [vmem:[#allocation9 + $0x8] sm:$0xff] (!%p1452_p12)  ;;  %vm626_vm1 = vcmp.lt.s32.totalorder (!%p1452_p12), %v2359_v60, 16 }
  0xae   : > { %1485 = vmatpush3.bf16.msra.mxu0 %v1761_v4  ;;  %v1771_v16 = vld [vmem:[%s2316_s20 + $0x30] sm:$0xff]   ;;  %v1773_v18 = vld [vmem:[%s2316_s20 + $0x38] sm:$0xff]   ;;  %v1600_v32 = vpack.c.bf16 (!%p1452_p12), %v537_v29, %v536_v28  ;;  %v540_v36 = vld [vmem:[#allocation9 + $0x20] sm:$0xff] (!%p1452_p12) }
  0xaf   : > { %1486 = vmatprep.subr.bf16.mxu0 %v1762_v5  ;;  %515 = vmatprep.mubr.bf16.mxu0 %v1435_v13  ;;  %v538_v33 = vld [vmem:[#allocation9 + $0x10] sm:$0xff] (!%p1452_p12)  ;;  %v539_v34 = vld [vmem:[#allocation9 + $0x18] sm:$0xff] (!%p1452_p12)  ;;  %v541_v37 = vld [vmem:[#allocation9 + $0x28] sm:$0xff] (!%p1452_p12) }
  0xb0   : > { %v1603_v35 = vpack.c.bf16 (!%p1452_p12), %v539_v34, %v538_v33  ;;  %v1606_v38 = vpack.c.bf16 (!%p1452_p12), %v541_v37, %v540_v36  ;;  %v542_v39 = vld [vmem:[#allocation9 + $0x30] sm:$0xff] (!%p1452_p12)  ;;  %v543_v40 = vld [vmem:[#allocation9 + $0x38] sm:$0xff] (!%p1452_p12)  ;;  %v544_v43 = vld [vmem:[#allocation9 + $0x40] sm:$0xff] (!%p1452_p12) }
  0xb1   : > { %v1609_v42 = vpack.c.bf16 (!%p1452_p12), %v543_v40, %v542_v39  ;;  %v545_v44 = vld [vmem:[#allocation9 + $0x48] sm:$0xff] (!%p1452_p12)  ;;  %v546_v46 = vld [vmem:[#allocation9 + $0x50] sm:$0xff] (!%p1452_p12)  ;;  %v547_v47 = vld [vmem:[#allocation9 + $0x58] sm:$0xff] (!%p1452_p12) }
  0xb2   : > { %1487 = vmatpush3.bf16.msra.mxu0 %v1763_v6  ;;  %v1612_v45 = vpack.c.bf16 (!%p1452_p12), %v545_v44, %v544_v43  ;;  %v1615_v48 = vpack.c.bf16 (!%p1452_p12), %v547_v47, %v546_v46  ;;  %v548_v49 = vld [vmem:[#allocation9 + $0x60] sm:$0xff] (!%p1452_p12)  ;;  %v549_v50 = vld [vmem:[#allocation9 + $0x68] sm:$0xff] (!%p1452_p12)  ;;  %v550_v52 = vld [vmem:[#allocation9 + $0x70] sm:$0xff] (!%p1452_p12) }
  0xb3   : > { %1488 = vmatprep.subr.bf16.mxu0 %v1764_v7  ;;  %v1618_v51 = vpack.c.bf16 (!%p1452_p12), %v549_v50, %v548_v49  ;;  %v551_v53 = vld [vmem:[#allocation9 + $0x78] sm:$0xff] (!%p1452_p12) }
  0xb4   : > { %v1621_v54 = vpack.c.bf16 (!%p1452_p12), %v551_v53, %v550_v52 }
  0xb6   : > { %1489 = vmatpush3.bf16.msra.mxu0 %v1765_v8 }
  0xb7   : > { %1490 = vmatprep.subr.bf16.mxu0 %v1766_v9 }
  0xba   : > { %1491 = vmatpush3.bf16.msra.mxu0 %v1767_v10 }
  0xbb   : > { %1492 = vmatprep.subr.bf16.mxu0 %v1768_v11 }
  0xbe   : > { %1493 = vmatpush3.bf16.msra.mxu0 %v1769_v14 }
  0xbf   : > { %1494 = vmatprep.subr.bf16.mxu0 %v1770_v15 }
  0xc2   : > { %1495 = vmatpush3.bf16.msra.mxu0 %v1771_v16 }
  0xc3   : > { %1496 = vmatprep.subr.bf16.mxu0 %v1772_v17 }
  0xc6   : > { %1497 = vmatpush3.bf16.msra.mxu0 %v1773_v18 }
  0xc7   : > { %1599 = vmatprep.subr.bf16.mxu0 (!%p1452_p12), %v2054_v31 }
  0xc9   : > { %516 = vmatmul.mubr.bf16.vlgmr.msra.gmra.mrb[0].mxu0 %v1434_v19 }
  0xca   : > { %1581 = vmatprep.mubr.msk.f32.mxu0 (!%p1452_p12), %vm2055_vm0, %v2056_v41 }
  0xcf   : > { %1601 = vmatpush3.bf16.xpose.msra.mxu0 (!%p1452_p12), %v1600_v32 }
  0xd0   : > { %1602 = vmatprep.subr.bf16.mxu0 (!%p1452_p12), %v2054_v31 }
  0xd7   : > { %1604 = vmatpush3.bf16.xpose.msra.mxu0 (!%p1452_p12), %v1603_v35 }
  0xd8   : > { %1605 = vmatprep.subr.bf16.mxu0 (!%p1452_p12), %v2054_v31 }
  0xdf   : > { %1607 = vmatpush3.bf16.xpose.msra.mxu0 (!%p1452_p12), %v1606_v38 }
  0xe0   : > { %1608 = vmatprep.subr.bf16.mxu0 (!%p1452_p12), %v2054_v31 }
  0xe7   : > { %1610 = vmatpush3.bf16.xpose.msra.mxu0 (!%p1452_p12), %v1609_v42 }
  0xe8   : > { %1611 = vmatprep.subr.bf16.mxu0 (!%p1452_p12), %v2054_v31 }
  0xef   : > { %1613 = vmatpush3.bf16.xpose.msra.mxu0 (!%p1452_p12), %v1612_v45 }
  0xf0   : > { %1614 = vmatprep.subr.bf16.mxu0 (!%p1452_p12), %v2054_v31 }
  0xf7   : > { %1616 = vmatpush3.bf16.xpose.msra.mxu0 (!%p1452_p12), %v1615_v48 }
  0xf8   : > { %1617 = vmatprep.subr.bf16.mxu0 (!%p1452_p12), %v2054_v31 }
  0xff   : > { %1619 = vmatpush3.bf16.xpose.msra.mxu0 (!%p1452_p12), %v1618_v51 }
 0x100   : > { %1620 = vmatprep.subr.bf16.mxu0 (!%p1452_p12), %v2054_v31 }
 0x107   : > { %1622 = vmatpush3.bf16.xpose.msra.mxu0 (!%p1452_p12), %v1621_v54 }
 0x108   : > { %1589 = vmatprep.subr.mxu0 (!%p1452_p12), %v2056_v41 }
 0x19c   : > { %v1498_v20 = vpop.f32.mrb[0].mxu0  ;;  %528 = sbr.rel (%p1452_p12) target bundleno = 4345 (0x10f9), region = 68 }
 0x19d   : > { %v1499_v22 = vpop.f32.mrb[1].mxu0 }
 0x19e   : > { %v1500_v23 = vadd.f32 %v1499_v22, %v1498_v20  ;;  %v1501_v24 = vpop.f32.mrb[2].mxu0 }
 0x19f   : > { %v1502_v25 = vpop.f32.mrb[3].mxu0 }
 0x1a0   : > { %v523_v26 = vadd.f32 %v1500_v23, %v346_v21 }
 0x1a2   : > { %524 = vst [vmem:[#allocation2] sm:$0xff] %v523_v26 }
 0x1a9   : > { %v529_v27 = vld [vmem:[#allocation2] sm:$0xff] }
 0x1aa   : > { %v530_v30 = vmul.f32 %v529_v27, %v529_v27 }
 0x1ac   : > { %531 = vadd.xlane.f32.xlu0 %v530_v30 }
 0x239   : > { %v532_v55 = vpop.xlane.xlu0 %531 }
 0x23a   : > { %v533_v56 = vadd.f32 1e-12, %v532_v55 }
 0x23c   : > { %1792 = vrsqrt.f32 %v533_v56 }
 0x246   : > { %v1793_v57 = vpop.eup %1792 }
 0x247   : > { %v2354_v58 = vmul.f32 %v1793_v57, %v529_v27 }
 0x249   : > { %1582 = vmatmul.mubr.f32.vlgmr.msra.gmra.mrb[0].mxu0 %v2354_v58 }
 0x24a   : > { %1591 = vmatprep.mubr.msk.f32.mxu0 %vm2055_vm0, %v2056_v41 }
 0x31c   : > { %v618_v61 = vpop.f32.mrb[0].mxu0 }
 0x31d   : > { %v622_v62 = vmul.f32 100.0, %v618_v61  ;;  %v1583_v63 = vpop.f32.mrb[1].mxu0 }
 0x31f   : > { %623 = vst [vmem:[#allocation13] sm:$0xff] %v622_v62  ;;  %v627_v0 = vsel %vm626_vm1, %v622_v62, -1e+30 }
 0x320   : > { %628 = vmax.xlane.f32.xlu0 %v627_v0 }
 0x3ad   : > { %v629_v1 = vpop.xlane.xlu0 %628 }
 0x3ae   : > { %vm630_vm2 = vcmp.ge.f32.partialorder %v627_v0, %v629_v1 }
 0x3af   : > { %v631_v2 = vsel %vm630_vm2, %v2359_v60, 128  ;;  %vm1235_vm2 = vcmask 64512  }
 0x3b0   : > { %v633_v3 = vshra.s32 %v631_v2, 16  ;;  %v632_v5 = vand.u32 65535, %v631_v2 }
 0x3b2   : > { %v635_v4 = vcvt.s32.f32 %v633_v3  ;;  %v634_v7 = vcvt.s32.f32 %v632_v5 }
 0x3b4   : > { %636 = vmin.xlane.f32.xlu1 %v635_v4 }
 0x441   : > { %v637_v6 = vpop.xlane.xlu1 %636 }
 0x442   : > { %vm638_vm3 = vcmp.eq.f32.partialorder %v635_v4, %v637_v6  ;;  %v643_v9 = vcvt.f32.s32 %v637_v6 }
 0x443   : > { %v639_v8 = vsel %vm638_vm3, %v634_v7, inf  ;;  %v743_v7 = vld [vmem:[#allocation12 + $0x8] sm:$0xff] }
 0x444   : > { %640 = vmin.xlane.f32.xlu1 %v639_v8  ;;  %v644_v11 = vshll.u32 %v643_v9, 16  ;;  %v745_v8 = vld [vmem:[#allocation12 + $0x18] sm:$0xff]  ;;  %v742_v9 = vld [vmem:[#allocation12] sm:$0xff] }
 0x4d1   : > { %v641_v10 = vpop.xlane.xlu1 %640 }
 0x4d2   : > { %v642_v12 = vcvt.f32.s32 %v641_v10  ;;  %v1623_v10 = vpack.c.bf16 %v745_v8, %v743_v7  ;;  %v1778_v8 = vld [vmem:[#allocation10 + $0x48] sm:$0xff]  }
 0x4d4   : > { %v645_v13 = vadd.s32 %v644_v11, %v642_v12  ;;  %v744_v11 = vld [vmem:[#allocation12 + $0x10] sm:$0xff]  ;;  %v747_v12 = vld [vmem:[#allocation12 + $0x28] sm:$0xff]  ;;  %1624 = vmatprep.subr.bf16.mxu1 %v1623_v10 }
 0x4d5   : > { %v1780_v10 = vld [vmem:[#allocation10 + $0x50] sm:$0xff]  }
 0x4d6   : > { %vm646_vm4 = vcmp.eq.s32.totalorder %v2359_v60, %v645_v13  ;;  %v749_v13 = vld [vmem:[#allocation12 + $0x38] sm:$0xff] }
 0x4d7   : > { %v650_v14 = vsel %vm646_vm4, -1e+30, %v627_v0  ;;  %v1453_v28 = vsel %vm646_vm4, 1.0, %v2056_v41 }
 0x4d8   : > { %651 = vmax.xlane.f32.xlu0 %v650_v14 }
 0x565   : > { %v652_v15 = vpop.xlane.xlu0 %651 }
 0x566   : > { %vm653_vm5 = vcmp.ge.f32.partialorder %v650_v14, %v652_v15  ;;  %v1627_v15 = vpack.c.bf16 %v749_v13, %v747_v12  ;;  %v1782_v12 = vld [vmem:[#allocation10 + $0x58] sm:$0xff]  }
 0x567   : > { %v654_v16 = vsel %vm653_vm5, %v2359_v60, 128  ;;  %v1783_v13 = vld [vmem:[#allocation10 + $0x18] sm:$0xff]  }
 0x568   : > { %v656_v17 = vshra.s32 %v654_v16, 16  ;;  %v655_v19 = vand.u32 65535, %v654_v16  ;;  %v746_v16 = vld [vmem:[#allocation12 + $0x20] sm:$0xff] }
 0x56a   : > { %v658_v18 = vcvt.s32.f32 %v656_v17  ;;  %v657_v21 = vcvt.s32.f32 %v655_v19  ;;  %v748_v17 = vld [vmem:[#allocation12 + $0x30] sm:$0xff]  ;;  %v753_v19 = vld [vmem:[#allocation12 + $0x58] sm:$0xff] }
 0x56c   : > { %659 = vmin.xlane.f32.xlu1 %v658_v18 }
 0x5f9   : > { %v660_v20 = vpop.xlane.xlu1 %659 }
 0x5fa   : > { %vm661_vm6 = vcmp.eq.f32.partialorder %v658_v18, %v660_v20  ;;  %v666_v23 = vcvt.f32.s32 %v660_v20  ;;  %v751_v18 = vld [vmem:[#allocation12 + $0x48] sm:$0xff]  ;;  %v1629_v20 = vpack.c.bf16 %v748_v17, %v746_v16  ;;  %v1788_v16 = vld [vmem:[#allocation10 + $0x70] sm:$0xff]  }
 0x5fb   : > { %v662_v22 = vsel %vm661_vm6, %v657_v21, inf  ;;  %v1631_v21 = vpack.c.bf16 %v753_v19, %v751_v18  ;;  %v1789_v17 = vld [vmem:[#allocation10 + $0x30] sm:$0xff]   ;;  %v1790_v18 = vld [vmem:[#allocation10 + $0x78] sm:$0xff]  }
 0x5fc   : > { %663 = vmin.xlane.f32.xlu0 %v662_v22  ;;  %v667_v25 = vshll.u32 %v666_v23, 16  ;;  %v750_v22 = vld [vmem:[#allocation12 + $0x40] sm:$0xff]  ;;  %v752_v23 = vld [vmem:[#allocation12 + $0x50] sm:$0xff]  ;;  %v1791_v19 = vld [vmem:[#allocation10 + $0x38] sm:$0xff]  }
 0x689   : > { %v664_v24 = vpop.xlane.xlu0 %663 }
 0x68a   : > { %v665_v26 = vcvt.f32.s32 %v664_v24  ;;  %v755_v24 = vld [vmem:[#allocation12 + $0x68] sm:$0xff] }
 0x68c   : > { %v668_v27 = vadd.s32 %v667_v25, %v665_v26  ;;  %v757_v25 = vld [vmem:[#allocation12 + $0x78] sm:$0xff]  ;;  %v1633_v26 = vpack.c.bf16 %v752_v23, %v750_v22 }
 0x68e   : > { %vm669_vm7 = vcmp.eq.s32.totalorder %v2359_v60, %v668_v27  ;;  %v1635_v27 = vpack.c.bf16 %v757_v25, %v755_v24 }
 0x68f   : > { %v673_v29 = vsel %vm669_vm7, -1e+30, %v650_v14  ;;  %v1454_v30 = vsel %vm669_vm7, 1.0, %v2056_v41  ;;  %v1625_v14 = vpack.c.bf16 %v744_v11, %v742_v9  ;;  %v1779_v9 = vld [vmem:[#allocation10 + $0x8] sm:$0xff]   ;;  %v1781_v11 = vld [vmem:[#allocation10 + $0x10] sm:$0xff]  }
 0x690   : > { %674 = vmax.xlane.f32.xlu1 %v673_v29  ;;  %v672_v31 = vadd.f32 %v1454_v30, %v1453_v28  ;;  %v754_v28 = vld [vmem:[#allocation12 + $0x60] sm:$0xff]  ;;  %v759_v30 = vld [vmem:[#allocation12 + $0x88] sm:$0xff] }
 0x691   : > { %1626 = vmatpush1.bf16.msra.mxu1 %v1625_v14  ;;  %v1784_v14 = vld [vmem:[#allocation10 + $0x60] sm:$0xff]  }
 0x692   : > { %1628 = vmatprep.subr.bf16.mxu1 %v1627_v15  ;;  %v1786_v15 = vld [vmem:[#allocation10 + $0x68] sm:$0xff]  }
 0x695   : > { %1630 = vmatpush1.bf16.msra.mxu1 %v1629_v20 }
 0x696   : > { %1632 = vmatprep.subr.bf16.mxu1 %v1631_v21 }
 0x699   : > { %1634 = vmatpush1.bf16.msra.mxu1 %v1633_v26 }
 0x69a   : > { %1636 = vmatprep.subr.bf16.mxu1 %v1635_v27 }
 0x71d   : > { %v675_v32 = vpop.xlane.xlu1 %674 }
 0x71e   : > { %vm676_vm8 = vcmp.ge.f32.partialorder %v673_v29, %v675_v32 }
 0x71f   : > { %v677_v33 = vsel %vm676_vm8, %v2359_v60, 128 }
 0x720   : > { %v679_v34 = vshra.s32 %v677_v33, 16  ;;  %v678_v36 = vand.u32 65535, %v677_v33 }
 0x722   : > { %v681_v35 = vcvt.s32.f32 %v679_v34  ;;  %v680_v38 = vcvt.s32.f32 %v678_v36  ;;  %v758_v34 = vld [vmem:[#allocation12 + $0x80] sm:$0xff]  ;;  %v763_v36 = vld [vmem:[#allocation12 + $0xa8] sm:$0xff] }
 0x724   : > { %682 = vmin.xlane.f32.xlu0 %v681_v35 }
 0x7b1   : > { %v683_v37 = vpop.xlane.xlu0 %682 }
 0x7b2   : > { %vm684_vm9 = vcmp.eq.f32.partialorder %v681_v35, %v683_v37  ;;  %v689_v40 = vcvt.f32.s32 %v683_v37  ;;  %v760_v35 = vld [vmem:[#allocation12 + $0x90] sm:$0xff]  ;;  %v765_v37 = vld [vmem:[#allocation12 + $0xb8] sm:$0xff] }
 0x7b3   : > { %v685_v39 = vsel %vm684_vm9, %v680_v38, inf  ;;  %v1641_v38 = vpack.c.bf16 %v760_v35, %v758_v34 }
 0x7b4   : > { %686 = vmin.xlane.f32.xlu1 %v685_v39  ;;  %v690_v43 = vshll.u32 %v689_v40, 16  ;;  %v1643_v39 = vpack.c.bf16 %v765_v37, %v763_v36  ;;  %v762_v40 = vld [vmem:[#allocation12 + $0xa0] sm:$0xff] }
 0x841   : > { %v687_v42 = vpop.xlane.xlu1 %686 }
 0x842   : > { %v688_v44 = vcvt.f32.s32 %v687_v42  ;;  %v764_v42 = vld [vmem:[#allocation12 + $0xb0] sm:$0xff] }
 0x844   : > { %v691_v45 = vadd.s32 %v690_v43, %v688_v44  ;;  %v1645_v43 = vpack.c.bf16 %v764_v42, %v762_v40 }
 0x846   : > { %vm692_vm10 = vcmp.eq.s32.totalorder %v2359_v60, %v691_v45 }
 0x847   : > { %v696_v46 = vsel %vm692_vm10, -1e+30, %v673_v29  ;;  %v1455_v47 = vsel %vm692_vm10, 1.0, %v2056_v41  ;;  %v756_v29 = vld [vmem:[#allocation12 + $0x70] sm:$0xff] }
 0x848   : > { %697 = vmax.xlane.f32.xlu0 %v696_v46  ;;  %v695_v48 = vadd.f32 %v1455_v47, %v672_v31  ;;  %v761_v31 = vld [vmem:[#allocation12 + $0x98] sm:$0xff]  ;;  %v1637_v32 = vpack.c.bf16 %v756_v29, %v754_v28 }
 0x849   : > { %v1639_v33 = vpack.c.bf16 %v761_v31, %v759_v30 }
 0x84a   : > { %1638 = vmatpush1.bf16.msra.mxu1 %v1637_v32 }
 0x84b   : > { %1640 = vmatprep.subr.bf16.mxu1 %v1639_v33 }
 0x84e   : > { %1642 = vmatpush1.bf16.msra.mxu1 %v1641_v38 }
 0x84f   : > { %1644 = vmatprep.subr.bf16.mxu1 %v1643_v39 }
 0x852   : > { %1646 = vmatpush1.bf16.msra.mxu1 %v1645_v43 }
 0x8d5   : > { %v698_v49 = vpop.xlane.xlu0 %697 }
 0x8d6   : > { %vm699_vm11 = vcmp.ge.f32.partialorder %v696_v46, %v698_v49  ;;  %v769_v49 = vld [vmem:[#allocation12 + $0xd8] sm:$0xff] }
 0x8d7   : > { %v700_v50 = vsel %vm699_vm11, %v2359_v60, 128 }
 0x8d8   : > { %v702_v51 = vshra.s32 %v700_v50, 16  ;;  %v701_v53 = vand.u32 65535, %v700_v50 }
 0x8da   : > { %v704_v52 = vcvt.s32.f32 %v702_v51  ;;  %v703_v55 = vcvt.s32.f32 %v701_v53  ;;  %v766_v51 = vld [vmem:[#allocation12 + $0xc0] sm:$0xff] }
 0x8dc   : > { %705 = vmin.xlane.f32.xlu1 %v704_v52 }
 0x969   : > { %v706_v54 = vpop.xlane.xlu1 %705 }
 0x96a   : > { %vm707_vm12 = vcmp.eq.f32.partialorder %v704_v52, %v706_v54  ;;  %v712_v57 = vcvt.f32.s32 %v706_v54  ;;  %v768_v52 = vld [vmem:[#allocation12 + $0xd0] sm:$0xff]  ;;  %v771_v54 = vld [vmem:[#allocation12 + $0xe8] sm:$0xff] }
 0x96b   : > { %v708_v56 = vsel %vm707_vm12, %v703_v55, inf  ;;  %v1649_v53 = vpack.c.bf16 %v768_v52, %v766_v51  ;;  %v773_v55 = vld [vmem:[#allocation12 + $0xf8] sm:$0xff] }
 0x96c   : > { %709 = vmin.xlane.f32.xlu0 %v708_v56  ;;  %v713_v61 = vshll.u32 %v712_v57, 16  ;;  %v1651_v56 = vpack.c.bf16 %v773_v55, %v771_v54  ;;  %v770_v57 = vld [vmem:[#allocation12 + $0xe0] sm:$0xff] }
 0x9f9   : > { %v710_v59 = vpop.xlane.xlu0 %709 }
 0x9fa   : > { %v711_v62 = vcvt.f32.s32 %v710_v59  ;;  %v772_v59 = vld [vmem:[#allocation12 + $0xf0] sm:$0xff] }
 0x9fc   : > { %v714_v63 = vadd.s32 %v713_v61, %v711_v62  ;;  %v1653_v61 = vpack.c.bf16 %v772_v59, %v770_v57  ;;  %v1776_v62 = vld [vmem:[#allocation10 + $0x40] sm:$0xff]  }
 0x9fe   : > { %vm715_vm13 = vcmp.eq.s32.totalorder %v2359_v60, %v714_v63 }
 0x9ff   : > { %v719_v0 = vsel %vm715_vm13, -1e+30, %v696_v46  ;;  %v1456_v1 = vsel %vm715_vm13, 1.0, %v2056_v41 }
 0xa00   : > { %720 = vmax.xlane.f32.xlu1 %v719_v0  ;;  %v2378_v2 = vadd.f32 %v1456_v1, %v695_v48  ;;  %v767_v48 = vld [vmem:[#allocation12 + $0xc8] sm:$0xff] }
 0xa01   : > { %v1647_v50 = vpack.c.bf16 %v769_v49, %v767_v48 }
 0xa03   : > { %1648 = vmatprep.subr.bf16.mxu1 %v1647_v50 }
 0xa04   : > { %1650 = vmatpush1.bf16.msra.mxu1 %v1649_v53 }
 0xa05   : > { %1652 = vmatprep.subr.bf16.mxu1 %v1651_v56 }
 0xa08   : > { %1654 = vmatpush1.bf16.msra.mxu1 %v1653_v61 }
 0xa09   : > { %1521 = vmatprep.subr.bf16.mxu1 %v1776_v62 }
 0xa8d   : > { %v721_v3 = vpop.xlane.xlu1 %720 }
 0xa8e   : > { %vm722_vm14 = vcmp.ge.f32.partialorder %v719_v0, %v721_v3 }
 0xa8f   : > { %v723_v4 = vsel %vm722_vm14, %v2359_v60, 128 }
 0xa90   : > { %v725_v5 = vshra.s32 %v723_v4, 16  ;;  %v724_v44 = vand.u32 65535, %v723_v4 }
 0xa92   : > { %v727_v6 = vcvt.s32.f32 %v725_v5  ;;  %v726_v46 = vcvt.s32.f32 %v724_v44 }
 0xa94   : > { %728 = vmin.xlane.f32.xlu0 %v727_v6 }
 0xb21   : > { %v729_v45 = vpop.xlane.xlu0 %728 }
 0xb22   : > { %vm730_vm15 = vcmp.eq.f32.partialorder %v727_v6, %v729_v45  ;;  %v735_v63 = vcvt.f32.s32 %v729_v45  ;;  %v1777_v6 = vld [vmem:[#allocation10] sm:$0xff]  }
 0xb23   : > { %v731_v47 = vsel %vm730_vm15, %v726_v46, inf }
 0xb24   : > { %732 = vmin.xlane.f32.xlu1 %v731_v47  ;;  %v736_v1 = vshll.u32 %v735_v63, 16 }
 0xbb1   : > { %v733_v0 = vpop.xlane.xlu1 %732 }
 0xbb2   : > { %v734_v3 = vcvt.f32.s32 %v733_v0 }
 0xbb4   : > { %v737_v4 = vadd.s32 %v736_v1, %v734_v3 }
 0xbb6   : > { %vm738_vm1 = vcmp.eq.s32.totalorder %v2359_v60, %v737_v4  ;;  %v1785_v60 = vld [vmem:[#allocation10 + $0x20] sm:$0xff]  }
 0xbb7   : > { %v1457_v5 = vsel %vm738_vm1, 1.0, %v2056_v41 }
 0xbb8   : > { %v741_v7 = vadd.f32 %v1457_v5, %v2378_v2  ;;  %v1787_v2 = vld [vmem:[#allocation10 + $0x28] sm:$0xff]  }
 0xbba   : > { %839 = vmatmul.mubr.f32.vlgmr.msra.gmra.mrb[0].mxu1 %v741_v7 }
 0xbbb   : > { %1522 = vmatpush3.bf16.msra.mxu1 %v1777_v6 }
 0xbbc   : > { %1523 = vmatprep.subr.bf16.mxu1 %v1778_v8 }
 0xbbf   : > { %1524 = vmatpush3.bf16.msra.mxu1 %v1779_v9 }
 0xbc0   : > { %1525 = vmatprep.subr.bf16.mxu1 %v1780_v10 }
 0xbc3   : > { %1526 = vmatpush3.bf16.msra.mxu1 %v1781_v11 }
 0xbc4   : > { %1527 = vmatprep.subr.bf16.mxu1 %v1782_v12 }
 0xbc7   : > { %1528 = vmatpush3.bf16.msra.mxu1 %v1783_v13 }
 0xbc8   : > { %1529 = vmatprep.subr.bf16.mxu1 %v1784_v14 }
 0xbcb   : > { %1530 = vmatpush3.bf16.msra.mxu1 %v1785_v60 }
 0xbcc   : > { %1531 = vmatprep.subr.bf16.mxu1 %v1786_v15 }
 0xbcf   : > { %1532 = vmatpush3.bf16.msra.mxu1 %v1787_v2 }
 0xbd0   : > { %1533 = vmatprep.subr.bf16.mxu1 %v1788_v16 }
 0xbd3   : > { %1534 = vmatpush3.bf16.msra.mxu1 %v1789_v17 }
 0xbd4   : > { %1535 = vmatprep.subr.bf16.mxu1 %v1790_v18 }
 0xbd7   : > { %1536 = vmatpush3.bf16.msra.mxu1 %v1791_v19 }
 0xbd8   : > { %1584 = vmatprep.subr.mxu1 %v2056_v41 }
 0xc8d   : > { %v840_v20 = vpop.f32.mrb[0].mxu1 }
 0xc8e   : > { %v845_v21 = vmul.f32 0.2, %v840_v20  ;;  %v842_v22 = vpop.f32.mrb[1].mxu1 }
 0xc8f   : > { %v846_v23 = vmul.f32 0.2, %v842_v22 }
 0xc90   : > { %v847_v25 = vpack.c.bf16 %v845_v21, %v845_v21 }
 0xc91   : > { %v848_v24 = vpack.c.bf16 %v846_v23, %v846_v23 }
 0xc93   : > { %1009 = vmatprep.mubr.bf16.mxu1 %v848_v24 }
 0xc94   : > { %1010 = vmatmul.mubr.bf16.vlgmr.msra.gmra.mrb[4].mxu1 %v847_v25 }
 0xc95   : > { %1586 = vmatprep.mubr.msk.f32.mxu1 %vm2055_vm0, %v2056_v41 }
 0xd67   : > { %v1537_v26 = vpop.f32.mrb[4].mxu1 }
 0xd68   : > { %v1538_v27 = vpop.f32.mrb[5].mxu1 }
 0xd69   : > { %v1539_v28 = vadd.f32 %v1538_v27, %v1537_v26  ;;  %v1540_v29 = vpop.f32.mrb[6].mxu1 }
 0xd6a   : > { %v1541_v30 = vpop.f32.mrb[7].mxu1 }
 0xd6b   : > { %v1017_v31 = vmul.f32 %v1539_v28, %v1539_v28 }
 0xd6d   : > { %1018 = vadd.xlane.f32.xlu0 %v1017_v31 }
 0xdfa   : > { %v1019_v32 = vpop.xlane.xlu0 %1018 }
 0xdfb   : > { %v1020_v33 = vadd.f32 1e-12, %v1019_v32 }
 0xdfd   : > { %1794 = vrsqrt.f32 %v1020_v33 }
 0xe07   : > { %v1795_v34 = vpop.eup %1794 }
 0xe08   : > { %v1022_v35 = vmul.f32 %v1795_v34, %v1539_v28 }
 0xe0a   : > { %1585 = vmatpush3.xpose.msra.mxu1 %v1022_v35  ;;  %1590 = vmatpush3.xpose.msra.mxu0 %v1022_v35 }
 0xe0b   : > { %1594 = vmatprep.subr.mxu0 %v2056_v41 }
 0xe0d   : > { %1587 = vmatmul.mubr.f32.vlgmr.msra.gmra.mrb[2].mxu1 %v2354_v58  ;;  %1592 = vmatmul.mubr.f32.vlgmr.msra.gmra.mrb[2].mxu0 %v1022_v35 }
 0xe0e   : > { %1595 = vmatpush3.xpose.msra.mxu0 %v2354_v58  ;;  %1596 = vmatprep.mubr.msk.f32.mxu0 %vm2055_vm0, %v2056_v41 }
 0xe15   : > { %1597 = vmatmul.mubr.f32.vlgmr.msra.gmra.mrb[2].mxu0 %v2354_v58 }
 0xee0   : > { %v1089_v36 = vpop.f32.mrb[2].mxu1 }
 0xee1   : > { %v1588_v37 = vpop.f32.mrb[3].mxu1  ;;  %v1093_v41 = vmul.f32 100.0, %v1089_v36 }
 0xee3   : > { %v1247_v58 = vsel %vm1235_vm2, %v1093_v41, -inf }
 0xee4   : > { %v1248_v48 = vrot.slane %v1247_v58, 4 }
 0xee6   : > { %v1249_v49 = vmax.f32 %v1247_v58, %v1248_v48 }
 0xee8   : > { %v1230_v38 = vpop.f32.mrb[2].mxu0  ;;  %v1250_v50 = vrot.slane %v1249_v49, 2 }
 0xee9   : > { %v1234_v39 = vmul.f32 50.0, %v1230_v38  ;;  %v1598_v40 = vpop.f32.mrb[3].mxu0 }
 0xeea   : > { %v1251_v51 = vmax.f32 %v1249_v49, %v1250_v50 }
 0xeeb   : > { %v1236_v42 = vsel %vm1235_vm2, %v1234_v39, -inf }
 0xeec   : > { %1237 = vmax.xlane.f32.xlu1 %v1236_v42  ;;  %v1252_v52 = vrot.slane %v1251_v51, 1 }
 0xeee   : > { %v1253_v53 = vmax.f32 %v1251_v51, %v1252_v52 }
 0xef0   : > { %v1254_v54 = vsub.f32 %v1093_v41, %v1253_v53 }
 0xef2   : > { %v1255_v55 = vmul.f32 1.442695, %v1254_v54 }
 0xf79   : > { %v1238_v43 = vpop.xlane.xlu1 %1237 }
 0xf7a   : > { %v1239_v44 = vsub.f32 %v1234_v39, %v1238_v43 }
 0xf7c   : > { %v1240_v45 = vmul.f32 1.442695, %v1239_v44 }
 0xf7e   : > { %1796 = vpow2.f32 %v1240_v45 }
 0xf7f   : > { %1798 = vpow2.f32 %v1255_v55 }
 0xf88   : > { %v1797_v46 = vpop.eup %1796 }
 0xf89   : > { %v1242_v47 = vsel %vm1235_vm2, %v1797_v46, 0.0  ;;  %v1799_v56 = vpop.eup %1798 }
 0xf8a   : > { %1243 = vadd.xlane.f32.xlu0 %v1242_v47  ;;  %v1257_v57 = vsel %vm1235_vm2, %v1799_v56, 0.0 }
 0xf8b   : > { %v1258_v59 = vrot.slane %v1257_v57, 4 }
 0xf8d   : > { %v1259_v61 = vadd.f32 %v1258_v59, %v1257_v57 }
 0xf8f   : > { %v1260_v62 = vrot.slane %v1259_v61, 2 }
 0xf91   : > { %v1261_v63 = vadd.f32 %v1260_v62, %v1259_v61 }
 0xf93   : > { %v1262_v0 = vrot.slane %v1261_v63, 1 }
 0xf95   : > { %v1263_v1 = vadd.f32 %v1262_v0, %v1261_v63 }
 0xf97   : > { %1800 = vlog2.f32 %v1263_v1 }
 0xfa1   : > { %v1801_v4 = vpop.eup %1800 }
 0xfa2   : > { %v1265_v5 = vmul.f32 0.6931472, %v1801_v4 }
 0xfa4   : > { %v1266_v8 = vsub.f32 %v1254_v54, %v1265_v5 }
0x1017   : > { %v1244_v3 = vpop.xlane.xlu0 %1243 }
0x1018   : > { %1802 = vrcp.f32 %v1244_v3 }
0x1022   : > { %v1803_v6 = vpop.eup %1802 }
0x1023   : > { %v1246_v7 = vmul.f32 %v1803_v6, %v1797_v46 }
0x1025   : > { %v1267_v9 = vsub.f32 0.0, %v1246_v7 }
0x1027   : > { %v1268_v10 = vmul.f32 %v1267_v9, %v1266_v8 }
0x1029   : > { %v1269_v11 = vsel %vm1235_vm2, %v1268_v10, 0.0 }
0x102a   : > { %1270 = vadd.xlane.f32.xlu1 %v1269_v11 }
0x10b7   : > { %v1271_v12 = vpop.xlane.xlu1 %1270 }
0x10b8   : > { %v1272_v13 = vrot.slane %v1271_v12, 4 }
0x10ba   : > { %v1273_v14 = vadd.f32 %v1272_v13, %v1271_v12 }
0x10bc   : > { %v1274_v60 = vrot.slane %v1273_v14, 2 }
0x10be   : > { %v1275_v15 = vadd.f32 %v1274_v60, %v1273_v14 }
0x10c0   : > { %v1276_v2 = vrot.slane %v1275_v15, 1 }
0x10c2   : > { %v1277_v16 = vadd.f32 %v1276_v2, %v1275_v15 }
0x10c4   : > { %1657 = vpush %v1277_v16 }
0x10f5   : > { %s1658_s26 = spop %1657 }
0x10f6   : > { %s1281_s27 = smul.f32 0.125, %s1658_s26 }
0x10f8   : > { %1283 = sst [smem:[#allocation14]] %s1281_s27 }
0x10f9 PF: > { %p1707_p0 = scmp.eq.s32.totalorder %s2113_s25, 3  ;;  %s2057_s30 = smov [#allocation13]  }
0x10fa   : > { %s1291_s9 = sshll.u32 %s2057_s30, 4  ;;  %s1292_s9 = int_to_ptr.vmem [resolvable:$true] %s1291_s9 }
0x10fb   : > { %s1948_s14 = scalar_lea.vmem %s1292_s9, 128  ;;  %p1955_p10 = scmp.lt.s32.totalorder %s1292_s9, %s1292_s9 }
0x10fc   : > { %p1949_p2 = scmp.ne.s32.totalorder %s1292_s9, %s1948_s14  ;;  %p1956_p9 = scmp.lt.s32.totalorder %s1948_s14, %s1948_s14 }
0x10fe   : > { %p1950_p13 = pnand %p1949_p2, %p1707_p0  ;;  %p1957_p11 = por %p1956_p9, %p1955_p10 }
0x1100   : > { %p1951_p3 = pneg %p1950_p13 }
0x1102   : > { %p1958_p7 = pnand %p1957_p11, %p1951_p3 }
0x1104   : > { %1961 = shalt.err (!%p1958_p7)
}
0x1105   : > { %s1962_s29 = scalar_lea.hbm %s2459_s5, 128 }
0x1106   : > { %p1963_p8 = scmp.ne.s32.totalorder %s2459_s5, %s1962_s29  ;;  %p1968_p5 = scmp.lt.u32.totalorder %s1962_s29, %s2459_s5 }
0x1108   : > { %p1964_p1 = pnand %p1963_p8, %p1707_p0 }
0x110a   : > { %p1965_p4 = pneg %p1964_p1 }
0x110c   : > { %p1970_p6 = pnand %p1968_p5, %p1965_p4 }
0x110e   : > { %1973 = shalt.err (!%p1970_p6)
}
0x110f   : > { %1676 = dma.vmem_to_hbm [thread:$0]  (%p1707_p0), %s1292_s9, 128, %s2459_s5, [#allocation5]  }
0x1110   : > { %s1974_s8 = scalar_lea.hbm %s2460_s6, 16 }
0x1111   : > { %p1975_p12 = scmp.ne.s32.totalorder %s2460_s6, %s1974_s8  ;;  %p1980_p3 = scmp.lt.u32.totalorder %s1974_s8, %s2460_s6 }
0x1113   : > { %p1976_p2 = pnand %p1975_p12, %p1707_p0 }
0x1115   : > { %p1977_p13 = pneg %p1976_p2 }
0x1117   : > { %p1982_p10 = pnand %p1980_p3, %p1977_p13 }
0x1119   : > { %1985 = shalt.err (!%p1982_p10)
}
0x111a   : > { %s2058_s30 = smov [#allocation14]  }
0x111b   : > { %1678 = dma.smem_to_hbm (%p1707_p0), %s2058_s30, 16, %s2460_s6, [#allocation6]  }
0x111c   : > { %2019 = dma.done.wait (%p1707_p0), [#allocation5], 128  }
0x111d   : > { %2021 = vsyncadd (%p1707_p0), [#allocation5], 4294967168 }
0x111e   : > { %2023 = dma.done.wait (%p1707_p0), [#allocation6], 16  }
0x111f   : > { %2025 = vsyncadd (%p1707_p0), [#allocation6], 4294967280 }
0x1120   : > { %1312 = sfence }
0x1121 PF: > { %p23_p9 = scmp.ge.s32.totalorder %s2209_s18, 6   ;;  %s2478_s21 = smov %s2032_s22 }
0x1122   : > { %s2479_s22 = smov %s2036_s23  ;;  %s2480_s23 = smov %s2219_s28 }
0x1123   : > { %s2481_s24 = smov %s2209_s18  ;;  %25 = sbr.rel (!%p23_p9) target bundleno = 8 (0x8), region = 120 }
0x112a   :  { %1318 = vsyncpa [#allocation4], 1 }
0x112b   :  { %1320 = vsyncpa [#allocation4 + $0x1], 1 }
0x112c   :  { %1321 = vsyncpa [#allocation8], 1 }
0x112d   :  { %1323 = vsyncpa [#allocation8 + $0x1], 1 }
0x112e   :  { %1324 = vsyncpa [#allocation11], 1 }
0x112f   :  { %1325 = vsyncpa [#allocation5], 1 }
0x1130   :  { %1327 = vsyncpa [#allocation5 + $0x1], 1 }
0x1131   :  { %1328 = vsyncpa [#allocation6], 1 }
0x1132   :  { %1330 = vsyncpa [#allocation6 + $0x1], 1 }

</bundles_post_ra>
